<compile_context>
chip_gen: v7x
topology: tpu7x:2x2x1
jax: 0.10.0
libtpu: 0.0.40
codegen_flags: <defaults>
</compile_context>

<pallas_src>
import functools

import jax
import jax.numpy as jnp
from jax import lax
from jax.experimental import pallas as pl
from jax.experimental.pallas import tpu as pltpu


def clip_attention_kernel(x_ref, wq_ref, wk_ref, wv_ref, wo_ref,
                          bq_ref, bk_ref, bv_ref, bo_ref,
                          o_ref, acc_ref,
                          *, bblk, seq, embed, heads_in_group, head_dim):
    g = pl.program_id(1)

    @pl.when(g == 0)
    def _init():
        acc_ref[...] = jnp.zeros_like(acc_ref)

    m = bblk * seq
    # Fold the batch block into the matmul M dimension.
    x = x_ref[...].reshape(m, embed).astype(jnp.bfloat16)

    # Group-sliced Q/K/V projections (bf16 MXU inputs, fp32 accumulation).
    # The softmax scale is already folded into wq/bq on the host.
    q = jnp.dot(x, wq_ref[...], preferred_element_type=jnp.float32) + bq_ref[...]
    k = jnp.dot(x, wk_ref[...], preferred_element_type=jnp.float32) + bk_ref[...]
    v = jnp.dot(x, wv_ref[...], preferred_element_type=jnp.float32) + bv_ref[...]

    qb = q.astype(jnp.bfloat16)
    kb = k.astype(jnp.bfloat16)
    vb = v.astype(jnp.bfloat16)
    wo = wo_ref[...]                      # (group_width, E), bf16

    qkt_dims = (((1,), (1,)), ((), ()))   # contract last dims -> no K transpose

    for b in range(bblk):
        r = b * seq
        ctx_out = jnp.zeros((seq, embed), jnp.float32)
        for h in range(heads_in_group):
            lo = h * head_dim
            hi = lo + head_dim
            qh = qb[r:r + seq, lo:hi]     # (T, Dh)
            kh = kb[r:r + seq, lo:hi]
            vh = vb[r:r + seq, lo:hi]

            s = lax.dot_general(qh, kh, qkt_dims,
                                preferred_element_type=jnp.float32)   # (T, T) fp32
            s = s - jnp.max(s, axis=-1, keepdims=True)
            p = jnp.exp(s)
            p = p * pl.reciprocal(jnp.sum(p, axis=-1, keepdims=True), approx=True)
            # TODO(synk): dropout on attention probs skipped (eval mode / p=0 semantics)

            oh = jnp.dot(p.astype(jnp.bfloat16), vh,
                         preferred_element_type=jnp.float32)          # (T, Dh)
            # Accumulate this head's contribution to the output projection
            # (replaces the concatenate + single big out-proj matmul).
            ctx_out = ctx_out + jnp.dot(oh.astype(jnp.bfloat16), wo[lo:hi, :],
                                        preferred_element_type=jnp.float32)
        acc_ref[r:r + seq, :] += ctx_out

    @pl.when(g == pl.num_programs(1) - 1)
    def _finalize():
        out = acc_ref[...] + bo_ref[...]
        o_ref[...] = out.reshape(bblk, seq, embed).astype(o_ref.dtype)


def clip_attention(hidden_states, params, *, num_heads, group_lane_target=128):
    """hidden_states: (B, T, E) float32.  params: dict of (E, E) input-major
    weights and (1, E) biases (fp32, unscaled -- scale is folded here)."""
    B, T, E = hidden_states.shape
    head_dim = E // num_heads
    scale = head_dim ** (-0.5)

    # Host-side parameter prep: fold the 1/sqrt(Dh) scale into the Q projection
    # and cast weights to bf16 for the MXU (biases stay fp32).
    wq = (params["wq"] * scale).astype(jnp.bfloat16)
    wk = params["wk"].astype(jnp.bfloat16)
    wv = params["wv"].astype(jnp.bfloat16)
    wo = params["wo"].astype(jnp.bfloat16)
    bq = (params["bq"] * scale).astype(jnp.float32)
    bk = params["bk"].astype(jnp.float32)
    bv = params["bv"].astype(jnp.float32)
    bo = params["bo"].astype(jnp.float32)

    # Heads per group: the group's lane width should be a multiple of 128 lanes
    # (vreg/MXU width) when head_dim allows it, otherwise cover all heads.
    if head_dim % group_lane_target == 0:
        heads_per_group = 1
    elif (group_lane_target % head_dim == 0
          and num_heads % (group_lane_target // head_dim) == 0):
        heads_per_group = group_lane_target // head_dim
    else:
        heads_per_group = num_heads
    num_groups = num_heads // heads_per_group
    gw = heads_per_group * head_dim

    # Fold batch into the matmul M dimension when T is small (fills MXU rows,
    # amortizes per-grid-step overhead).
    bblk = 1
    for cand in range(B, 0, -1):
        if B % cand == 0 and cand * T <= 256:
            bblk = cand
            break

    kernel = functools.partial(
        clip_attention_kernel, bblk=bblk, seq=T, embed=E,
        heads_in_group=heads_per_group, head_dim=head_dim)

    flops = 8 * B * T * E * E + 4 * B * num_heads * T * T * head_dim
    bytes_accessed = 2 * B * T * E * 4 + 4 * E * E * 2 + 4 * E * 4
    cost = pl.CostEstimate(flops=flops,
                           transcendentals=B * num_heads * T * T,
                           bytes_accessed=bytes_accessed)

    return pl.pallas_call(
        kernel,
        out_shape=jax.ShapeDtypeStruct((B, T, E), hidden_states.dtype),
        grid_spec=pltpu.PrefetchScalarGridSpec(
            num_scalar_prefetch=0,
            grid=(B // bblk, num_groups),
            in_specs=[
                pl.BlockSpec((bblk, T, E), lambda b, g: (b, 0, 0)),   # x
                pl.BlockSpec((E, gw), lambda b, g: (0, g)),           # Wq (scaled)
                pl.BlockSpec((E, gw), lambda b, g: (0, g)),           # Wk
                pl.BlockSpec((E, gw), lambda b, g: (0, g)),           # Wv
                pl.BlockSpec((gw, E), lambda b, g: (g, 0)),           # Wo
                pl.BlockSpec((1, gw), lambda b, g: (0, g)),           # bq (scaled)
                pl.BlockSpec((1, gw), lambda b, g: (0, g)),           # bk
                pl.BlockSpec((1, gw), lambda b, g: (0, g)),           # bv
                pl.BlockSpec((1, E), lambda b, g: (0, 0)),            # bo
            ],
            out_specs=pl.BlockSpec((bblk, T, E), lambda b, g: (b, 0, 0)),
            scratch_shapes=[pltpu.VMEM((bblk * T, E), jnp.float32)],
        ),
        compiler_params=pltpu.CompilerParams(
            dimension_semantics=("parallel", "arbitrary")),
        cost_estimate=cost,
    )(hidden_states, wq, wk, wv, wo, bq, bk, bv, bo)


def clip_attention_reference(x, params, *, num_heads):
    """Pure-JAX fp32 reference mirroring the PyTorch forward (masks=None, eval)."""
    B, T, E = x.shape
    Dh = E // num_heads
    scale = Dh ** (-0.5)
    q = (x @ params["wq"] + params["bq"]) * scale
    k = x @ params["wk"] + params["bk"]
    v = x @ params["wv"] + params["bv"]

    def split(t):  # (B, T, E) -> (B, H, T, Dh)
        return t.reshape(B, T, num_heads, Dh).transpose(0, 2, 1, 3)

    q, k, v = split(q), split(k), split(v)
    w = jnp.einsum("bhtd,bhsd->bhts", q, k)
    w = jax.nn.softmax(w, axis=-1)
    o = jnp.einsum("bhts,bhsd->bhtd", w, v)
    o = o.transpose(0, 2, 1, 3).reshape(B, T, E)
    return o @ params["wo"] + params["bo"]


if __name__ == "__main__":
    # Small config consistent with the module: embed_dim divisible by num_heads.
    B, T, E, H = 2, 8, 32, 4

    key = jax.random.PRNGKey(0)
    keys = jax.random.split(key, 9)

    # Deterministic synthetic parameters.  PyTorch Linear weight is (out, in);
    # we store the transpose (in, out) so the kernel does x @ W + b.
    def linear_params(kw, kb):
        w = jax.random.normal(kw, (E, E), jnp.float32) * 0.05
        b = jax.random.normal(kb, (1, E), jnp.float32) * 0.05
        return w, b

    wq, bq = linear_params(keys[0], keys[1])
    wk, bk = linear_params(keys[2], keys[3])
    wv, bv = linear_params(keys[4], keys[5])
    wo, bo = linear_params(keys[6], keys[7])
    params = dict(wq=wq, wk=wk, wv=wv, wo=wo, bq=bq, bk=bk, bv=bv, bo=bo)

    x = jax.random.normal(keys[8], (B, T, E), jnp.float32)

    out = clip_attention(x, params, num_heads=H)
    out = jax.block_until_ready(out)

    ref = clip_attention_reference(x, params, num_heads=H)
    assert out.shape == (B, T, E)
    # bf16 MXU inputs loosen the achievable tolerance vs the fp32 reference.
    assert jnp.allclose(out, ref, atol=2e-2, rtol=2e-2), "mismatch vs reference"

    print("KERNEL_OK")
</pallas_src>

<mosaic_0001>
module attributes {stable_mosaic.version = 11 : i64} {
  func.func @clip_attention_kernel(%arg0: i32, %arg1: i32, %arg2: memref<2x8x32xf32, #tpu.memory_space<vmem>>, %arg3: memref<32x32xbf16, #tpu.memory_space<vmem>>, %arg4: memref<32x32xbf16, #tpu.memory_space<vmem>>, %arg5: memref<32x32xbf16, #tpu.memory_space<vmem>>, %arg6: memref<32x32xbf16, #tpu.memory_space<vmem>>, %arg7: memref<1x32xf32, #tpu.memory_space<vmem>>, %arg8: memref<1x32xf32, #tpu.memory_space<vmem>>, %arg9: memref<1x32xf32, #tpu.memory_space<vmem>>, %arg10: memref<1x32xf32, #tpu.memory_space<vmem>>, %arg11: memref<2x8x32xf32, #tpu.memory_space<vmem>>, %arg12: memref<16x32xf32, #tpu.memory_space<vmem>>) attributes {dimension_semantics = [#tpu.dimension_semantics<parallel>, #tpu.dimension_semantics<arbitrary>], iteration_bounds = array<i64: 1, 1>, scalar_prefetch = 0 : i64, scratch_operands = 1 : i64, tpu.core_type = #tpu.core_type<tc>, window_params = [{transform_indices = @transform_0, window_bounds = array<i64: 2, 8, 32>}, {transform_indices = @transform_1, window_bounds = array<i64: 32, 32>}, {transform_indices = @transform_2, window_bounds = array<i64: 32, 32>}, {transform_indices = @transform_3, window_bounds = array<i64: 32, 32>}, {transform_indices = @transform_4, window_bounds = array<i64: 32, 32>}, {transform_indices = @transform_5, window_bounds = array<i64: 1, 32>}, {transform_indices = @transform_6, window_bounds = array<i64: 1, 32>}, {transform_indices = @transform_7, window_bounds = array<i64: 1, 32>}, {pipeline_mode = #tpu.pipeline_mode<synchronous>, transform_indices = @transform_8, window_bounds = array<i64: 1, 32>}, {transform_indices = @transform_9, window_bounds = array<i64: 2, 8, 32>}]} {
    %c0_i32 = arith.constant 0 : i32
    %0 = arith.cmpi eq, %arg1, %c0_i32 : i32
    %1 = arith.extui %0 : i1 to i32
    %c0_i32_0 = arith.constant 0 : i32
    %2 = arith.cmpi ne, %1, %c0_i32_0 : i32
    scf.if %2 {
      %cst_70 = arith.constant 0.000000e+00 : f32
      %196 = vector.broadcast %cst_70 : f32 to vector<16x32xf32>
      %c0_71 = arith.constant 0 : index
      %c0_72 = arith.constant 0 : index
      %197 = vector.load %arg12[%c0_71, %c0_72] : memref<16x32xf32, #tpu.memory_space<vmem>>, vector<16x32xf32>
      tpu.vector_store %arg12[%c0_71, %c0_72], %196 {strides = array<i32>} : memref<16x32xf32, #tpu.memory_space<vmem>>, vector<16x32xf32>,
    } else {
    }
    %c0 = arith.constant 0 : index
    %c0_1 = arith.constant 0 : index
    %c0_2 = arith.constant 0 : index
    %3 = vector.load %arg2[%c0, %c0_1, %c0_2] : memref<2x8x32xf32, #tpu.memory_space<vmem>>, vector<2x8x32xf32>
    %4 = vector.shape_cast %3 : vector<2x8x32xf32> to vector<16x32xf32>
    %5 = arith.truncf %4 : vector<16x32xf32> to vector<16x32xbf16>
    %c0_3 = arith.constant 0 : index
    %c0_4 = arith.constant 0 : index
    %6 = vector.load %arg3[%c0_3, %c0_4] : memref<32x32xbf16, #tpu.memory_space<vmem>>, vector<32x32xbf16>
    %cst = arith.constant dense<0.000000e+00> : vector<16x32xf32>
    %7 = tpu.matmul %5, %6, %cst {dimension_numbers = #tpu.dot_dimension_numbers<[1], [0], [0], [1], [0, 0, 1, 1], [], []>} : vector<16x32xbf16>, vector<32x32xbf16>, vector<16x32xf32> -> vector<16x32xf32>
    %c0_5 = arith.constant 0 : index
    %c0_6 = arith.constant 0 : index
    %8 = vector.load %arg7[%c0_5, %c0_6] : memref<1x32xf32, #tpu.memory_space<vmem>>, vector<1x32xf32>
    %9 = vector.broadcast %8 : vector<1x32xf32> to vector<16x32xf32>
    %10 = arith.addf %7, %9 : vector<16x32xf32>
    %c0_7 = arith.constant 0 : index
    %c0_8 = arith.constant 0 : index
    %11 = vector.load %arg4[%c0_7, %c0_8] : memref<32x32xbf16, #tpu.memory_space<vmem>>, vector<32x32xbf16>
    %cst_9 = arith.constant dense<0.000000e+00> : vector<16x32xf32>
    %12 = tpu.matmul %5, %11, %cst_9 {dimension_numbers = #tpu.dot_dimension_numbers<[1], [0], [0], [1], [0, 0, 1, 1], [], []>} : vector<16x32xbf16>, vector<32x32xbf16>, vector<16x32xf32> -> vector<16x32xf32>
    %c0_10 = arith.constant 0 : index
    %c0_11 = arith.constant 0 : index
    %13 = vector.load %arg8[%c0_10, %c0_11] : memref<1x32xf32, #tpu.memory_space<vmem>>, vector<1x32xf32>
    %14 = vector.broadcast %13 : vector<1x32xf32> to vector<16x32xf32>
    %15 = arith.addf %12, %14 : vector<16x32xf32>
    %c0_12 = arith.constant 0 : index
    %c0_13 = arith.constant 0 : index
    %16 = vector.load %arg5[%c0_12, %c0_13] : memref<32x32xbf16, #tpu.memory_space<vmem>>, vector<32x32xbf16>
    %cst_14 = arith.constant dense<0.000000e+00> : vector<16x32xf32>
    %17 = tpu.matmul %5, %16, %cst_14 {dimension_numbers = #tpu.dot_dimension_numbers<[1], [0], [0], [1], [0, 0, 1, 1], [], []>} : vector<16x32xbf16>, vector<32x32xbf16>, vector<16x32xf32> -> vector<16x32xf32>
    %c0_15 = arith.constant 0 : index
    %c0_16 = arith.constant 0 : index
    %18 = vector.load %arg9[%c0_15, %c0_16] : memref<1x32xf32, #tpu.memory_space<vmem>>, vector<1x32xf32>
    %19 = vector.broadcast %18 : vector<1x32xf32> to vector<16x32xf32>
    %20 = arith.addf %17, %19 : vector<16x32xf32>
    %21 = arith.truncf %10 : vector<16x32xf32> to vector<16x32xbf16>
    %22 = arith.truncf %15 : vector<16x32xf32> to vector<16x32xbf16>
    %23 = arith.truncf %20 : vector<16x32xf32> to vector<16x32xbf16>
    %c0_17 = arith.constant 0 : index
    %c0_18 = arith.constant 0 : index
    %24 = vector.load %arg6[%c0_17, %c0_18] : memref<32x32xbf16, #tpu.memory_space<vmem>>, vector<32x32xbf16>
    %cst_19 = arith.constant 0.000000e+00 : f32
    %25 = vector.broadcast %cst_19 : f32 to vector<8x32xf32>
    %26 = vector.extract_strided_slice %21 {offsets = [0, 0], sizes = [8, 8], strides = [1, 1]} : vector<16x32xbf16> to vector<8x8xbf16>
    %27 = vector.extract_strided_slice %22 {offsets = [0, 0], sizes = [8, 8], strides = [1, 1]} : vector<16x32xbf16> to vector<8x8xbf16>
    %28 = vector.extract_strided_slice %23 {offsets = [0, 0], sizes = [8, 8], strides = [1, 1]} : vector<16x32xbf16> to vector<8x8xbf16>
    %cst_20 = arith.constant dense<0.000000e+00> : vector<8x8xf32>
    %29 = tpu.matmul %26, %27, %cst_20 {dimension_numbers = #tpu.dot_dimension_numbers<[1], [1], [0], [0], [0, 0, 1, 0], [], []>} : vector<8x8xbf16>, vector<8x8xbf16>, vector<8x8xf32> -> vector<8x8xf32>
    %cst_21 = arith.constant dense<0xFF800000> : vector<8xf32>
    %30 = vector.multi_reduction <maximumf>, %29, %cst_21 [1] : vector<8x8xf32> to vector<8xf32>
    %31 = vector.shape_cast %30 : vector<8xf32> to vector<8x1xf32>
    %32 = vector.broadcast %31 : vector<8x1xf32> to vector<8x8xf32>
    %33 = arith.subf %29, %32 : vector<8x8xf32>
    %34 = math.exp %33 : vector<8x8xf32>
    %cst_22 = arith.constant dense<0.000000e+00> : vector<8xf32>
    %35 = vector.multi_reduction <add>, %34, %cst_22 [1] : vector<8x8xf32> to vector<8xf32>
    %36 = vector.shape_cast %35 : vector<8xf32> to vector<8x1xf32>
    %37 = tpu.reciprocal %36 {approx = true} : vector<8x1xf32> -> vector<8x1xf32>
    %38 = vector.broadcast %37 : vector<8x1xf32> to vector<8x8xf32>
    %39 = arith.mulf %34, %38 : vector<8x8xf32>
    %40 = arith.truncf %39 : vector<8x8xf32> to vector<8x8xbf16>
    %cst_23 = arith.constant dense<0.000000e+00> : vector<8x8xf32>
    %41 = tpu.matmul %40, %28, %cst_23 {dimension_numbers = #tpu.dot_dimension_numbers<[1], [0], [0], [1], [0, 0, 1, 1], [], []>} : vector<8x8xbf16>, vector<8x8xbf16>, vector<8x8xf32> -> vector<8x8xf32>
    %42 = arith.truncf %41 : vector<8x8xf32> to vector<8x8xbf16>
    %43 = vector.extract_strided_slice %24 {offsets = [0, 0], sizes = [8, 32], strides = [1, 1]} : vector<32x32xbf16> to vector<8x32xbf16>
    %cst_24 = arith.constant dense<0.000000e+00> : vector<8x32xf32>
    %44 = tpu.matmul %42, %43, %cst_24 {dimension_numbers = #tpu.dot_dimension_numbers<[1], [0], [0], [1], [0, 0, 1, 1], [], []>} : vector<8x8xbf16>, vector<8x32xbf16>, vector<8x32xf32> -> vector<8x32xf32>
    %45 = arith.addf %25, %44 : vector<8x32xf32>
    %46 = vector.extract_strided_slice %21 {offsets = [0, 8], sizes = [8, 8], strides = [1, 1]} : vector<16x32xbf16> to vector<8x8xbf16>
    %47 = vector.extract_strided_slice %22 {offsets = [0, 8], sizes = [8, 8], strides = [1, 1]} : vector<16x32xbf16> to vector<8x8xbf16>
    %48 = vector.extract_strided_slice %23 {offsets = [0, 8], sizes = [8, 8], strides = [1, 1]} : vector<16x32xbf16> to vector<8x8xbf16>
    %cst_25 = arith.constant dense<0.000000e+00> : vector<8x8xf32>
    %49 = tpu.matmul %46, %47, %cst_25 {dimension_numbers = #tpu.dot_dimension_numbers<[1], [1], [0], [0], [0, 0, 1, 0], [], []>} : vector<8x8xbf16>, vector<8x8xbf16>, vector<8x8xf32> -> vector<8x8xf32>
    %cst_26 = arith.constant dense<0xFF800000> : vector<8xf32>
    %50 = vector.multi_reduction <maximumf>, %49, %cst_26 [1] : vector<8x8xf32> to vector<8xf32>
    %51 = vector.shape_cast %50 : vector<8xf32> to vector<8x1xf32>
    %52 = vector.broadcast %51 : vector<8x1xf32> to vector<8x8xf32>
    %53 = arith.subf %49, %52 : vector<8x8xf32>
    %54 = math.exp %53 : vector<8x8xf32>
    %cst_27 = arith.constant dense<0.000000e+00> : vector<8xf32>
    %55 = vector.multi_reduction <add>, %54, %cst_27 [1] : vector<8x8xf32> to vector<8xf32>
    %56 = vector.shape_cast %55 : vector<8xf32> to vector<8x1xf32>
    %57 = tpu.reciprocal %56 {approx = true} : vector<8x1xf32> -> vector<8x1xf32>
    %58 = vector.broadcast %57 : vector<8x1xf32> to vector<8x8xf32>
    %59 = arith.mulf %54, %58 : vector<8x8xf32>
    %60 = arith.truncf %59 : vector<8x8xf32> to vector<8x8xbf16>
    %cst_28 = arith.constant dense<0.000000e+00> : vector<8x8xf32>
    %61 = tpu.matmul %60, %48, %cst_28 {dimension_numbers = #tpu.dot_dimension_numbers<[1], [0], [0], [1], [0, 0, 1, 1], [], []>} : vector<8x8xbf16>, vector<8x8xbf16>, vector<8x8xf32> -> vector<8x8xf32>
    %62 = arith.truncf %61 : vector<8x8xf32> to vector<8x8xbf16>
    %63 = vector.extract_strided_slice %24 {offsets = [8, 0], sizes = [8, 32], strides = [1, 1]} : vector<32x32xbf16> to vector<8x32xbf16>
    %cst_29 = arith.constant dense<0.000000e+00> : vector<8x32xf32>
    %64 = tpu.matmul %62, %63, %cst_29 {dimension_numbers = #tpu.dot_dimension_numbers<[1], [0], [0], [1], [0, 0, 1, 1], [], []>} : vector<8x8xbf16>, vector<8x32xbf16>, vector<8x32xf32> -> vector<8x32xf32>
    %65 = arith.addf %45, %64 : vector<8x32xf32>
    %66 = vector.extract_strided_slice %21 {offsets = [0, 16], sizes = [8, 8], strides = [1, 1]} : vector<16x32xbf16> to vector<8x8xbf16>
    %67 = vector.extract_strided_slice %22 {offsets = [0, 16], sizes = [8, 8], strides = [1, 1]} : vector<16x32xbf16> to vector<8x8xbf16>
    %68 = vector.extract_strided_slice %23 {offsets = [0, 16], sizes = [8, 8], strides = [1, 1]} : vector<16x32xbf16> to vector<8x8xbf16>
    %cst_30 = arith.constant dense<0.000000e+00> : vector<8x8xf32>
    %69 = tpu.matmul %66, %67, %cst_30 {dimension_numbers = #tpu.dot_dimension_numbers<[1], [1], [0], [0], [0, 0, 1, 0], [], []>} : vector<8x8xbf16>, vector<8x8xbf16>, vector<8x8xf32> -> vector<8x8xf32>
    %cst_31 = arith.constant dense<0xFF800000> : vector<8xf32>
    %70 = vector.multi_reduction <maximumf>, %69, %cst_31 [1] : vector<8x8xf32> to vector<8xf32>
    %71 = vector.shape_cast %70 : vector<8xf32> to vector<8x1xf32>
    %72 = vector.broadcast %71 : vector<8x1xf32> to vector<8x8xf32>
    %73 = arith.subf %69, %72 : vector<8x8xf32>
    %74 = math.exp %73 : vector<8x8xf32>
    %cst_32 = arith.constant dense<0.000000e+00> : vector<8xf32>
    %75 = vector.multi_reduction <add>, %74, %cst_32 [1] : vector<8x8xf32> to vector<8xf32>
    %76 = vector.shape_cast %75 : vector<8xf32> to vector<8x1xf32>
    %77 = tpu.reciprocal %76 {approx = true} : vector<8x1xf32> -> vector<8x1xf32>
    %78 = vector.broadcast %77 : vector<8x1xf32> to vector<8x8xf32>
    %79 = arith.mulf %74, %78 : vector<8x8xf32>
    %80 = arith.truncf %79 : vector<8x8xf32> to vector<8x8xbf16>
    %cst_33 = arith.constant dense<0.000000e+00> : vector<8x8xf32>
    %81 = tpu.matmul %80, %68, %cst_33 {dimension_numbers = #tpu.dot_dimension_numbers<[1], [0], [0], [1], [0, 0, 1, 1], [], []>} : vector<8x8xbf16>, vector<8x8xbf16>, vector<8x8xf32> -> vector<8x8xf32>
    %82 = arith.truncf %81 : vector<8x8xf32> to vector<8x8xbf16>
    %83 = vector.extract_strided_slice %24 {offsets = [16, 0], sizes = [8, 32], strides = [1, 1]} : vector<32x32xbf16> to vector<8x32xbf16>
    %cst_34 = arith.constant dense<0.000000e+00> : vector<8x32xf32>
    %84 = tpu.matmul %82, %83, %cst_34 {dimension_numbers = #tpu.dot_dimension_numbers<[1], [0], [0], [1], [0, 0, 1, 1], [], []>} : vector<8x8xbf16>, vector<8x32xbf16>, vector<8x32xf32> -> vector<8x32xf32>
    %85 = arith.addf %65, %84 : vector<8x32xf32>
    %86 = vector.extract_strided_slice %21 {offsets = [0, 24], sizes = [8, 8], strides = [1, 1]} : vector<16x32xbf16> to vector<8x8xbf16>
    %87 = vector.extract_strided_slice %22 {offsets = [0, 24], sizes = [8, 8], strides = [1, 1]} : vector<16x32xbf16> to vector<8x8xbf16>
    %88 = vector.extract_strided_slice %23 {offsets = [0, 24], sizes = [8, 8], strides = [1, 1]} : vector<16x32xbf16> to vector<8x8xbf16>
    %cst_35 = arith.constant dense<0.000000e+00> : vector<8x8xf32>
    %89 = tpu.matmul %86, %87, %cst_35 {dimension_numbers = #tpu.dot_dimension_numbers<[1], [1], [0], [0], [0, 0, 1, 0], [], []>} : vector<8x8xbf16>, vector<8x8xbf16>, vector<8x8xf32> -> vector<8x8xf32>
    %cst_36 = arith.constant dense<0xFF800000> : vector<8xf32>
    %90 = vector.multi_reduction <maximumf>, %89, %cst_36 [1] : vector<8x8xf32> to vector<8xf32>
    %91 = vector.shape_cast %90 : vector<8xf32> to vector<8x1xf32>
    %92 = vector.broadcast %91 : vector<8x1xf32> to vector<8x8xf32>
    %93 = arith.subf %89, %92 : vector<8x8xf32>
    %94 = math.exp %93 : vector<8x8xf32>
    %cst_37 = arith.constant dense<0.000000e+00> : vector<8xf32>
    %95 = vector.multi_reduction <add>, %94, %cst_37 [1] : vector<8x8xf32> to vector<8xf32>
    %96 = vector.shape_cast %95 : vector<8xf32> to vector<8x1xf32>
    %97 = tpu.reciprocal %96 {approx = true} : vector<8x1xf32> -> vector<8x1xf32>
    %98 = vector.broadcast %97 : vector<8x1xf32> to vector<8x8xf32>
    %99 = arith.mulf %94, %98 : vector<8x8xf32>
    %100 = arith.truncf %99 : vector<8x8xf32> to vector<8x8xbf16>
    %cst_38 = arith.constant dense<0.000000e+00> : vector<8x8xf32>
    %101 = tpu.matmul %100, %88, %cst_38 {dimension_numbers = #tpu.dot_dimension_numbers<[1], [0], [0], [1], [0, 0, 1, 1], [], []>} : vector<8x8xbf16>, vector<8x8xbf16>, vector<8x8xf32> -> vector<8x8xf32>
    %102 = arith.truncf %101 : vector<8x8xf32> to vector<8x8xbf16>
    %103 = vector.extract_strided_slice %24 {offsets = [24, 0], sizes = [8, 32], strides = [1, 1]} : vector<32x32xbf16> to vector<8x32xbf16>
    %cst_39 = arith.constant dense<0.000000e+00> : vector<8x32xf32>
    %104 = tpu.matmul %102, %103, %cst_39 {dimension_numbers = #tpu.dot_dimension_numbers<[1], [0], [0], [1], [0, 0, 1, 1], [], []>} : vector<8x8xbf16>, vector<8x32xbf16>, vector<8x32xf32> -> vector<8x32xf32>
    %105 = arith.addf %85, %104 : vector<8x32xf32>
    %c0_40 = arith.constant 0 : index
    %c0_41 = arith.constant 0 : index
    %106 = vector.load %arg12[%c0_40, %c0_41] : memref<16x32xf32, #tpu.memory_space<vmem>>, vector<8x32xf32>
    %107 = arith.addf %106, %105 : vector<8x32xf32>
    %c0_42 = arith.constant 0 : index
    %c0_43 = arith.constant 0 : index
    %108 = vector.load %arg12[%c0_42, %c0_43] : memref<16x32xf32, #tpu.memory_space<vmem>>, vector<8x32xf32>
    tpu.vector_store %arg12[%c0_42, %c0_43], %107 {strides = array<i32>} : memref<16x32xf32, #tpu.memory_space<vmem>>, vector<8x32xf32>,
    %cst_44 = arith.constant 0.000000e+00 : f32
    %109 = vector.broadcast %cst_44 : f32 to vector<8x32xf32>
    %110 = vector.extract_strided_slice %21 {offsets = [8, 0], sizes = [8, 8], strides = [1, 1]} : vector<16x32xbf16> to vector<8x8xbf16>
    %111 = vector.extract_strided_slice %22 {offsets = [8, 0], sizes = [8, 8], strides = [1, 1]} : vector<16x32xbf16> to vector<8x8xbf16>
    %112 = vector.extract_strided_slice %23 {offsets = [8, 0], sizes = [8, 8], strides = [1, 1]} : vector<16x32xbf16> to vector<8x8xbf16>
    %cst_45 = arith.constant dense<0.000000e+00> : vector<8x8xf32>
    %113 = tpu.matmul %110, %111, %cst_45 {dimension_numbers = #tpu.dot_dimension_numbers<[1], [1], [0], [0], [0, 0, 1, 0], [], []>} : vector<8x8xbf16>, vector<8x8xbf16>, vector<8x8xf32> -> vector<8x8xf32>
    %cst_46 = arith.constant dense<0xFF800000> : vector<8xf32>
    %114 = vector.multi_reduction <maximumf>, %113, %cst_46 [1] : vector<8x8xf32> to vector<8xf32>
    %115 = vector.shape_cast %114 : vector<8xf32> to vector<8x1xf32>
    %116 = vector.broadcast %115 : vector<8x1xf32> to vector<8x8xf32>
    %117 = arith.subf %113, %116 : vector<8x8xf32>
    %118 = math.exp %117 : vector<8x8xf32>
    %cst_47 = arith.constant dense<0.000000e+00> : vector<8xf32>
    %119 = vector.multi_reduction <add>, %118, %cst_47 [1] : vector<8x8xf32> to vector<8xf32>
    %120 = vector.shape_cast %119 : vector<8xf32> to vector<8x1xf32>
    %121 = tpu.reciprocal %120 {approx = true} : vector<8x1xf32> -> vector<8x1xf32>
    %122 = vector.broadcast %121 : vector<8x1xf32> to vector<8x8xf32>
    %123 = arith.mulf %118, %122 : vector<8x8xf32>
    %124 = arith.truncf %123 : vector<8x8xf32> to vector<8x8xbf16>
    %cst_48 = arith.constant dense<0.000000e+00> : vector<8x8xf32>
    %125 = tpu.matmul %124, %112, %cst_48 {dimension_numbers = #tpu.dot_dimension_numbers<[1], [0], [0], [1], [0, 0, 1, 1], [], []>} : vector<8x8xbf16>, vector<8x8xbf16>, vector<8x8xf32> -> vector<8x8xf32>
    %126 = arith.truncf %125 : vector<8x8xf32> to vector<8x8xbf16>
    %127 = vector.extract_strided_slice %24 {offsets = [0, 0], sizes = [8, 32], strides = [1, 1]} : vector<32x32xbf16> to vector<8x32xbf16>
    %cst_49 = arith.constant dense<0.000000e+00> : vector<8x32xf32>
    %128 = tpu.matmul %126, %127, %cst_49 {dimension_numbers = #tpu.dot_dimension_numbers<[1], [0], [0], [1], [0, 0, 1, 1], [], []>} : vector<8x8xbf16>, vector<8x32xbf16>, vector<8x32xf32> -> vector<8x32xf32>
    %129 = arith.addf %109, %128 : vector<8x32xf32>
    %130 = vector.extract_strided_slice %21 {offsets = [8, 8], sizes = [8, 8], strides = [1, 1]} : vector<16x32xbf16> to vector<8x8xbf16>
    %131 = vector.extract_strided_slice %22 {offsets = [8, 8], sizes = [8, 8], strides = [1, 1]} : vector<16x32xbf16> to vector<8x8xbf16>
    %132 = vector.extract_strided_slice %23 {offsets = [8, 8], sizes = [8, 8], strides = [1, 1]} : vector<16x32xbf16> to vector<8x8xbf16>
    %cst_50 = arith.constant dense<0.000000e+00> : vector<8x8xf32>
    %133 = tpu.matmul %130, %131, %cst_50 {dimension_numbers = #tpu.dot_dimension_numbers<[1], [1], [0], [0], [0, 0, 1, 0], [], []>} : vector<8x8xbf16>, vector<8x8xbf16>, vector<8x8xf32> -> vector<8x8xf32>
    %cst_51 = arith.constant dense<0xFF800000> : vector<8xf32>
    %134 = vector.multi_reduction <maximumf>, %133, %cst_51 [1] : vector<8x8xf32> to vector<8xf32>
    %135 = vector.shape_cast %134 : vector<8xf32> to vector<8x1xf32>
    %136 = vector.broadcast %135 : vector<8x1xf32> to vector<8x8xf32>
    %137 = arith.subf %133, %136 : vector<8x8xf32>
    %138 = math.exp %137 : vector<8x8xf32>
    %cst_52 = arith.constant dense<0.000000e+00> : vector<8xf32>
    %139 = vector.multi_reduction <add>, %138, %cst_52 [1] : vector<8x8xf32> to vector<8xf32>
    %140 = vector.shape_cast %139 : vector<8xf32> to vector<8x1xf32>
    %141 = tpu.reciprocal %140 {approx = true} : vector<8x1xf32> -> vector<8x1xf32>
    %142 = vector.broadcast %141 : vector<8x1xf32> to vector<8x8xf32>
    %143 = arith.mulf %138, %142 : vector<8x8xf32>
    %144 = arith.truncf %143 : vector<8x8xf32> to vector<8x8xbf16>
    %cst_53 = arith.constant dense<0.000000e+00> : vector<8x8xf32>
    %145 = tpu.matmul %144, %132, %cst_53 {dimension_numbers = #tpu.dot_dimension_numbers<[1], [0], [0], [1], [0, 0, 1, 1], [], []>} : vector<8x8xbf16>, vector<8x8xbf16>, vector<8x8xf32> -> vector<8x8xf32>
    %146 = arith.truncf %145 : vector<8x8xf32> to vector<8x8xbf16>
    %147 = vector.extract_strided_slice %24 {offsets = [8, 0], sizes = [8, 32], strides = [1, 1]} : vector<32x32xbf16> to vector<8x32xbf16>
    %cst_54 = arith.constant dense<0.000000e+00> : vector<8x32xf32>
    %148 = tpu.matmul %146, %147, %cst_54 {dimension_numbers = #tpu.dot_dimension_numbers<[1], [0], [0], [1], [0, 0, 1, 1], [], []>} : vector<8x8xbf16>, vector<8x32xbf16>, vector<8x32xf32> -> vector<8x32xf32>
    %149 = arith.addf %129, %148 : vector<8x32xf32>
    %150 = vector.extract_strided_slice %21 {offsets = [8, 16], sizes = [8, 8], strides = [1, 1]} : vector<16x32xbf16> to vector<8x8xbf16>
    %151 = vector.extract_strided_slice %22 {offsets = [8, 16], sizes = [8, 8], strides = [1, 1]} : vector<16x32xbf16> to vector<8x8xbf16>
    %152 = vector.extract_strided_slice %23 {offsets = [8, 16], sizes = [8, 8], strides = [1, 1]} : vector<16x32xbf16> to vector<8x8xbf16>
    %cst_55 = arith.constant dense<0.000000e+00> : vector<8x8xf32>
    %153 = tpu.matmul %150, %151, %cst_55 {dimension_numbers = #tpu.dot_dimension_numbers<[1], [1], [0], [0], [0, 0, 1, 0], [], []>} : vector<8x8xbf16>, vector<8x8xbf16>, vector<8x8xf32> -> vector<8x8xf32>
    %cst_56 = arith.constant dense<0xFF800000> : vector<8xf32>
    %154 = vector.multi_reduction <maximumf>, %153, %cst_56 [1] : vector<8x8xf32> to vector<8xf32>
    %155 = vector.shape_cast %154 : vector<8xf32> to vector<8x1xf32>
    %156 = vector.broadcast %155 : vector<8x1xf32> to vector<8x8xf32>
    %157 = arith.subf %153, %156 : vector<8x8xf32>
    %158 = math.exp %157 : vector<8x8xf32>
    %cst_57 = arith.constant dense<0.000000e+00> : vector<8xf32>
    %159 = vector.multi_reduction <add>, %158, %cst_57 [1] : vector<8x8xf32> to vector<8xf32>
    %160 = vector.shape_cast %159 : vector<8xf32> to vector<8x1xf32>
    %161 = tpu.reciprocal %160 {approx = true} : vector<8x1xf32> -> vector<8x1xf32>
    %162 = vector.broadcast %161 : vector<8x1xf32> to vector<8x8xf32>
    %163 = arith.mulf %158, %162 : vector<8x8xf32>
    %164 = arith.truncf %163 : vector<8x8xf32> to vector<8x8xbf16>
    %cst_58 = arith.constant dense<0.000000e+00> : vector<8x8xf32>
    %165 = tpu.matmul %164, %152, %cst_58 {dimension_numbers = #tpu.dot_dimension_numbers<[1], [0], [0], [1], [0, 0, 1, 1], [], []>} : vector<8x8xbf16>, vector<8x8xbf16>, vector<8x8xf32> -> vector<8x8xf32>
    %166 = arith.truncf %165 : vector<8x8xf32> to vector<8x8xbf16>
    %167 = vector.extract_strided_slice %24 {offsets = [16, 0], sizes = [8, 32], strides = [1, 1]} : vector<32x32xbf16> to vector<8x32xbf16>
    %cst_59 = arith.constant dense<0.000000e+00> : vector<8x32xf32>
    %168 = tpu.matmul %166, %167, %cst_59 {dimension_numbers = #tpu.dot_dimension_numbers<[1], [0], [0], [1], [0, 0, 1, 1], [], []>} : vector<8x8xbf16>, vector<8x32xbf16>, vector<8x32xf32> -> vector<8x32xf32>
    %169 = arith.addf %149, %168 : vector<8x32xf32>
    %170 = vector.extract_strided_slice %21 {offsets = [8, 24], sizes = [8, 8], strides = [1, 1]} : vector<16x32xbf16> to vector<8x8xbf16>
    %171 = vector.extract_strided_slice %22 {offsets = [8, 24], sizes = [8, 8], strides = [1, 1]} : vector<16x32xbf16> to vector<8x8xbf16>
    %172 = vector.extract_strided_slice %23 {offsets = [8, 24], sizes = [8, 8], strides = [1, 1]} : vector<16x32xbf16> to vector<8x8xbf16>
    %cst_60 = arith.constant dense<0.000000e+00> : vector<8x8xf32>
    %173 = tpu.matmul %170, %171, %cst_60 {dimension_numbers = #tpu.dot_dimension_numbers<[1], [1], [0], [0], [0, 0, 1, 0], [], []>} : vector<8x8xbf16>, vector<8x8xbf16>, vector<8x8xf32> -> vector<8x8xf32>
    %cst_61 = arith.constant dense<0xFF800000> : vector<8xf32>
    %174 = vector.multi_reduction <maximumf>, %173, %cst_61 [1] : vector<8x8xf32> to vector<8xf32>
    %175 = vector.shape_cast %174 : vector<8xf32> to vector<8x1xf32>
    %176 = vector.broadcast %175 : vector<8x1xf32> to vector<8x8xf32>
    %177 = arith.subf %173, %176 : vector<8x8xf32>
    %178 = math.exp %177 : vector<8x8xf32>
    %cst_62 = arith.constant dense<0.000000e+00> : vector<8xf32>
    %179 = vector.multi_reduction <add>, %178, %cst_62 [1] : vector<8x8xf32> to vector<8xf32>
    %180 = vector.shape_cast %179 : vector<8xf32> to vector<8x1xf32>
    %181 = tpu.reciprocal %180 {approx = true} : vector<8x1xf32> -> vector<8x1xf32>
    %182 = vector.broadcast %181 : vector<8x1xf32> to vector<8x8xf32>
    %183 = arith.mulf %178, %182 : vector<8x8xf32>
    %184 = arith.truncf %183 : vector<8x8xf32> to vector<8x8xbf16>
    %cst_63 = arith.constant dense<0.000000e+00> : vector<8x8xf32>
    %185 = tpu.matmul %184, %172, %cst_63 {dimension_numbers = #tpu.dot_dimension_numbers<[1], [0], [0], [1], [0, 0, 1, 1], [], []>} : vector<8x8xbf16>, vector<8x8xbf16>, vector<8x8xf32> -> vector<8x8xf32>
    %186 = arith.truncf %185 : vector<8x8xf32> to vector<8x8xbf16>
    %187 = vector.extract_strided_slice %24 {offsets = [24, 0], sizes = [8, 32], strides = [1, 1]} : vector<32x32xbf16> to vector<8x32xbf16>
    %cst_64 = arith.constant dense<0.000000e+00> : vector<8x32xf32>
    %188 = tpu.matmul %186, %187, %cst_64 {dimension_numbers = #tpu.dot_dimension_numbers<[1], [0], [0], [1], [0, 0, 1, 1], [], []>} : vector<8x8xbf16>, vector<8x32xbf16>, vector<8x32xf32> -> vector<8x32xf32>
    %189 = arith.addf %169, %188 : vector<8x32xf32>
    %c8 = arith.constant 8 : index
    %c0_65 = arith.constant 0 : index
    %190 = vector.load %arg12[%c8, %c0_65] : memref<16x32xf32, #tpu.memory_space<vmem>>, vector<8x32xf32>
    %191 = arith.addf %190, %189 : vector<8x32xf32>
    %c8_66 = arith.constant 8 : index
    %c0_67 = arith.constant 0 : index
    %192 = vector.load %arg12[%c8_66, %c0_67] : memref<16x32xf32, #tpu.memory_space<vmem>>, vector<8x32xf32>
    tpu.vector_store %arg12[%c8_66, %c0_67], %191 {strides = array<i32>} : memref<16x32xf32, #tpu.memory_space<vmem>>, vector<8x32xf32>,
    %c0_i32_68 = arith.constant 0 : i32
    %193 = arith.cmpi eq, %arg1, %c0_i32_68 : i32
    %194 = arith.extui %193 : i1 to i32
    %c0_i32_69 = arith.constant 0 : i32
    %195 = arith.cmpi ne, %194, %c0_i32_69 : i32
    scf.if %195 {
      %c0_70 = arith.constant 0 : index
      %c0_71 = arith.constant 0 : index
      %196 = vector.load %arg12[%c0_70, %c0_71] : memref<16x32xf32, #tpu.memory_space<vmem>>, vector<16x32xf32>
      %c0_72 = arith.constant 0 : index
      %c0_73 = arith.constant 0 : index
      %197 = vector.load %arg10[%c0_72, %c0_73] : memref<1x32xf32, #tpu.memory_space<vmem>>, vector<1x32xf32>
      %198 = vector.broadcast %197 : vector<1x32xf32> to vector<16x32xf32>
      %199 = arith.addf %196, %198 : vector<16x32xf32>
      %200 = vector.shape_cast %199 : vector<16x32xf32> to vector<2x8x32xf32>
      %c0_74 = arith.constant 0 : index
      %c0_75 = arith.constant 0 : index
      %c0_76 = arith.constant 0 : index
      %201 = vector.load %arg11[%c0_74, %c0_75, %c0_76] : memref<2x8x32xf32, #tpu.memory_space<vmem>>, vector<2x8x32xf32>
      tpu.vector_store %arg11[%c0_74, %c0_75, %c0_76], %200 {strides = array<i32>} : memref<2x8x32xf32, #tpu.memory_space<vmem>>, vector<2x8x32xf32>,
    } else {
    }
    return
  }
  func.func @transform_0(%arg0: i32, %arg1: i32) -> (i32, i32, i32) {
    %c0_i32 = arith.constant 0 : i32
    %c0_i32_0 = arith.constant 0 : i32
    %c0_i32_1 = arith.constant 0 : i32
    return %arg0, %c0_i32, %c0_i32_0 : i32, i32, i32
  }
  func.func @transform_1(%arg0: i32, %arg1: i32) -> (i32, i32) {
    %c0_i32 = arith.constant 0 : i32
    %c0_i32_0 = arith.constant 0 : i32
    return %c0_i32, %arg1 : i32, i32
  }
  func.func @transform_2(%arg0: i32, %arg1: i32) -> (i32, i32) {
    %c0_i32 = arith.constant 0 : i32
    %c0_i32_0 = arith.constant 0 : i32
    return %c0_i32, %arg1 : i32, i32
  }
  func.func @transform_3(%arg0: i32, %arg1: i32) -> (i32, i32) {
    %c0_i32 = arith.constant 0 : i32
    %c0_i32_0 = arith.constant 0 : i32
    return %c0_i32, %arg1 : i32, i32
  }
  func.func @transform_4(%arg0: i32, %arg1: i32) -> (i32, i32) {
    %c0_i32 = arith.constant 0 : i32
    %c0_i32_0 = arith.constant 0 : i32
    return %arg1, %c0_i32 : i32, i32
  }
  func.func @transform_5(%arg0: i32, %arg1: i32) -> (i32, i32) {
    %c0_i32 = arith.constant 0 : i32
    %c0_i32_0 = arith.constant 0 : i32
    return %c0_i32, %arg1 : i32, i32
  }
  func.func @transform_6(%arg0: i32, %arg1: i32) -> (i32, i32) {
    %c0_i32 = arith.constant 0 : i32
    %c0_i32_0 = arith.constant 0 : i32
    return %c0_i32, %arg1 : i32, i32
  }
  func.func @transform_7(%arg0: i32, %arg1: i32) -> (i32, i32) {
    %c0_i32 = arith.constant 0 : i32
    %c0_i32_0 = arith.constant 0 : i32
    return %c0_i32, %arg1 : i32, i32
  }
  func.func @transform_8(%arg0: i32, %arg1: i32) -> (i32, i32) {
    %c0_i32 = arith.constant 0 : i32
    %c0_i32_0 = arith.constant 0 : i32
    %c0_i32_1 = arith.constant 0 : i32
    return %c0_i32, %c0_i32_0 : i32, i32
  }
  func.func @transform_9(%arg0: i32, %arg1: i32) -> (i32, i32, i32) {
    %c0_i32 = arith.constant 0 : i32
    %c0_i32_0 = arith.constant 0 : i32
    %c0_i32_1 = arith.constant 0 : i32
    return %arg0, %c0_i32, %c0_i32_0 : i32, i32, i32
  }
}

</mosaic_0001>

<bundles_post_ra>
// kernel: tpu_custom_call.1
= control target key start
LH: loop header
LB: loop body
LE: loop exit
PB: predicated region body
PF: predicated region fallthrough
CT: control target
= control target key end

     0   :  { %14 = vsyncpa [#allocation4], 0  ;;  %s2463_s0 = inlined_call_operand.hbm [shape: f32[2,8,32], index: 0, kind: input, shape index: {}]   ;;  %s2464_s1 = inlined_call_operand.hbm [shape: bf16[32,32], index: 1, kind: input, shape index: {}]   ;;  %s2465_s2 = inlined_call_operand.hbm [shape: bf16[32,32], index: 2, kind: input, shape index: {}]   ;;  %s2466_s3 = inlined_call_operand.hbm [shape: bf16[32,32], index: 3, kind: input, shape index: {}]   ;;  %s2467_s4 = inlined_call_operand.hbm [shape: bf16[32,32], index: 4, kind: input, shape index: {}]   ;;  %s2468_s5 = inlined_call_operand.vmem [shape: f32[1,32], index: 5, kind: input, shape index: {}]   ;;  %s2469_s6 = inlined_call_operand.vmem [shape: f32[1,32], index: 6, kind: input, shape index: {}]   ;;  %s2470_s7 = inlined_call_operand.vmem [shape: f32[1,32], index: 7, kind: input, shape index: {}]   ;;  %s2471_s8 = inlined_call_operand.vmem [shape: f32[1,32], index: 8, kind: input, shape index: {}]   ;;  %s2472_s9 = inlined_call_operand.hbm [shape: f32[2,8,32], index: 9, kind: output, shape index: {}]  }
   0x1   :  { %15 = vsyncpa [#allocation7], 0 }
   0x2   :  { %16 = vsyncpa [#allocation10], 0 }
   0x3   :  { %17 = vsyncpa [#allocation5], 0  ;;  %s2055_s30 = smov [#allocation6]   ;;  %s1915_s13 = scalar_lea.hbm %s2464_s1, 256 }
   0x4   :  { %s35_s10 = sshll.u32 %s2055_s30, 4  ;;  %p1916_p0 = scmp.ne.s32.totalorder %s2464_s1, %s1915_s13  ;;  %s36_s10 = int_to_ptr.vmem [resolvable:$true] %s35_s10 }
   0x5   :  { %p1919_p1 = scmp.lt.u32.totalorder %s1915_s13, %s2464_s1 }
   0x7   :  { %p1921_p2 = pnand %p1919_p1, %p1916_p0 }
   0x9   :  { %1924 = shalt.err (!%p1921_p2)
}
   0xa   :  { %s1925_s18 = scalar_lea.vmem %s36_s10, 256  ;;  %p1930_p4 = scmp.lt.s32.totalorder %s36_s10, %s36_s10 }
   0xb   :  { %p1926_p3 = scmp.ne.s32.totalorder %s36_s10, %s1925_s18  ;;  %p1931_p5 = scmp.lt.s32.totalorder %s1925_s18, %s1925_s18 }
   0xd   :  { %p1932_p6 = por %p1931_p5, %p1930_p4 }
   0xf   :  { %p1933_p7 = pnand %p1932_p6, %p1926_p3 }
  0x11   :  { %1936 = shalt.err (!%p1933_p7)
}
  0x12   :  { %s2056_s19 = smov 64   ;;  %s2057_s20 = smov 4  }
  0x13   :  { %41 = dma.hbm_to_vmem [thread:$0]  %s2464_s1, 256, %s36_s10, [#allocation7], %s2056_s19, %s2056_s19, %s2057_s20  }
  0x14   :  { %s2058_s23 = smov [#allocation9]   ;;  %s2059_s25 = smov [#allocation3]  }
  0x15   :  { %s59_s24 = sshll.u32 %s2058_s23, 4  ;;  %s23_s26 = sshll.u32 %s2059_s25, 4  ;;  %s60_s24 = int_to_ptr.vmem [resolvable:$true] %s59_s24  ;;  %s24_s26 = int_to_ptr.vmem [resolvable:$true] %s23_s26 }
  0x16   :  { %s1937_s29 = scalar_lea.hbm %s2466_s3, 256 }
  0x17   :  { %p1938_p8 = scmp.ne.s32.totalorder %s2466_s3, %s1937_s29  ;;  %p1941_p9 = scmp.lt.u32.totalorder %s1937_s29, %s2466_s3 }
  0x19   :  { %p1943_p10 = pnand %p1941_p9, %p1938_p8 }
  0x1b   :  { %1946 = shalt.err (!%p1943_p10)
}
  0x1c   :  { %s1947_s1 = scalar_lea.vmem %s60_s24, 256  ;;  %p1952_p12 = scmp.lt.s32.totalorder %s60_s24, %s60_s24 }
  0x1d   :  { %p1948_p11 = scmp.ne.s32.totalorder %s60_s24, %s1947_s1  ;;  %p1953_p13 = scmp.lt.s32.totalorder %s1947_s1, %s1947_s1 }
  0x1f   :  { %p1954_p0 = por %p1953_p13, %p1952_p12 }
  0x21   :  { %p1955_p1 = pnand %p1954_p0, %p1948_p11 }
  0x23   :  { %1958 = shalt.err (!%p1955_p1)
}
  0x24   :  { %65 = dma.hbm_to_vmem [thread:$0]  %s2466_s3, 256, %s60_s24, [#allocation10], %s2056_s19, %s2056_s19, %s2057_s20  }
  0x25   :  { %s1959_s17 = scalar_lea.hbm %s2463_s0, 256 }
  0x26   :  { %p1960_p2 = scmp.ne.s32.totalorder %s2463_s0, %s1959_s17  ;;  %p1963_p3 = scmp.lt.u32.totalorder %s1959_s17, %s2463_s0 }
  0x28   :  { %p1965_p4 = pnand %p1963_p3, %p1960_p2 }
  0x2a   :  { %1968 = shalt.err (!%p1965_p4)
}
  0x2b   :  { %s1969_s25 = scalar_lea.vmem %s24_s26, 256  ;;  %p1974_p6 = scmp.lt.s32.totalorder %s24_s26, %s24_s26 }
  0x2c   :  { %p1970_p5 = scmp.ne.s32.totalorder %s24_s26, %s1969_s25  ;;  %p1975_p7 = scmp.lt.s32.totalorder %s1969_s25, %s1969_s25 }
  0x2e   :  { %p1976_p8 = por %p1975_p7, %p1974_p6 }
  0x30   :  { %p1977_p9 = pnand %p1976_p8, %p1970_p5 }
  0x32   :  { %1980 = shalt.err (!%p1977_p9)
}
  0x33   :  { %s2060_s3 = smov 128   ;;  %s2061_s24 = smov 8  }
  0x34   :  { %29 = dma.hbm_to_vmem [thread:$0]  %s2463_s0, 256, %s24_s26, [#allocation4], %s2060_s3, %s2060_s3, %s2061_s24  }
  0x35   :  { %s2062_s29 = smov [#allocation8]   ;;  %s2063_s11 = smov [#allocation11]  }
  0x36   :  { %s47_s30 = sshll.u32 %s2062_s29, 4  ;;  %s71_s12 = sshll.u32 %s2063_s11, 4  ;;  %s48_s30 = int_to_ptr.vmem [resolvable:$true] %s47_s30  ;;  %s72_s12 = int_to_ptr.vmem [resolvable:$true] %s71_s12 }
  0x37   :  { %s1981_s10 = scalar_lea.hbm %s2465_s2, 256 }
  0x38   :  { %p1982_p10 = scmp.ne.s32.totalorder %s2465_s2, %s1981_s10  ;;  %p1985_p11 = scmp.lt.u32.totalorder %s1981_s10, %s2465_s2 }
  0x3a   :  { %p1987_p12 = pnand %p1985_p11, %p1982_p10 }
  0x3c   :  { %1990 = shalt.err (!%p1987_p12)
}
  0x3d   :  { %s1991_s0 = scalar_lea.vmem %s48_s30, 256  ;;  %p1996_p0 = scmp.lt.s32.totalorder %s48_s30, %s48_s30 }
  0x3e   :  { %p1992_p13 = scmp.ne.s32.totalorder %s48_s30, %s1991_s0  ;;  %p1997_p1 = scmp.lt.s32.totalorder %s1991_s0, %s1991_s0 }
  0x40   :  { %p1998_p2 = por %p1997_p1, %p1996_p0 }
  0x42   :  { %p1999_p3 = pnand %p1998_p2, %p1992_p13 }
  0x44   :  { %2002 = shalt.err (!%p1999_p3)
}
  0x45   :  { %53 = dma.hbm_to_vmem [thread:$0]  %s2465_s2, 256, %s48_s30, [#allocation7], %s2056_s19, %s2056_s19, %s2057_s20  }
  0x46   :  { %s2003_s23 = scalar_lea.hbm %s2467_s4, 256 }
  0x47   :  { %p2004_p4 = scmp.ne.s32.totalorder %s2467_s4, %s2003_s23  ;;  %p2007_p5 = scmp.lt.u32.totalorder %s2003_s23, %s2467_s4 }
  0x49   :  { %p2009_p6 = pnand %p2007_p5, %p2004_p4 }
  0x4b   :  { %2012 = shalt.err (!%p2009_p6)
}
  0x4c   :  { %s2013_s11 = scalar_lea.vmem %s72_s12, 256  ;;  %p2018_p8 = scmp.lt.s32.totalorder %s72_s12, %s72_s12 }
  0x4d   :  { %p2014_p7 = scmp.ne.s32.totalorder %s72_s12, %s2013_s11  ;;  %p2019_p9 = scmp.lt.s32.totalorder %s2013_s11, %s2013_s11 }
  0x4f   :  { %p2020_p10 = por %p2019_p9, %p2018_p8 }
  0x51   :  { %p2021_p11 = pnand %p2020_p10, %p2014_p7 }
  0x53   :  { %2024 = shalt.err (!%p2021_p11)
}
  0x54   :  { %77 = dma.hbm_to_vmem [thread:$0]  %s2467_s4, 256, %s72_s12, [#allocation10], %s2056_s19, %s2056_s19, %s2057_s20  }
  0x55   :  { %2047 = dma.done.wait [#allocation4], 256  }
  0x56   :  { %2048 = vsyncadd [#allocation4], 4294967040 }
  0x57   :  { %2049 = dma.done.wait [#allocation7], 512  }
  0x58   :  { %2050 = vsyncadd [#allocation7], 4294966784 }
  0x59   :  { %2051 = dma.done.wait [#allocation10], 512  }
  0x5a   :  { %2052 = vsyncadd [#allocation10], 4294966784  ;;  %vm106_vm0 = vcmask 261120   ;;  %v2064_v0 = vmov 0.0   ;;  %vm2065_vm1 = vmmov 0   ;;  %v1877_v1 = vld [vmem:[#allocation8] sm:$0xff]  }
  0x5b   :  { %1702 = vmatprep.subr.bf16.mxu1 %v2064_v0  ;;  %1694 = vmatprep.subr.bf16.mxu0 %v2064_v0  ;;  %107 = vst.msk [vmem:[#allocation2] sm:$0xff] %vm106_vm0, %v2064_v0  ;;  %108 = vst.msk [vmem:[#allocation2 + $0x8] sm:$0xff] %vm106_vm0, %v2064_v0  ;;  %v1878_v2 = vld [vmem:[#allocation8 + $0x8] sm:$0xff]   ;;  %v1879_v3 = vld [vmem:[#allocation6] sm:$0xff]   ;;  %vm315_vm2 = vcmask 64512   ;;  %s2067_s1 = smov 112  }
  0x5c   :  { %1706 = vmatprep.mubr.msk.bf16.mxu1 %vm2065_vm1, %v2064_v0  ;;  %1698 = vmatprep.mubr.msk.bf16.mxu0 %vm2065_vm1, %v2064_v0  ;;  %v109_v4 = vld [vmem:[#allocation3] sm:$0xff]  ;;  %v110_v5 = vld [vmem:[#allocation3 + $0x8] sm:$0xff]  ;;  %v1880_v6 = vld [vmem:[#allocation6 + $0x8] sm:$0xff]   ;;  %vm377_vm3 = vcmask 1043456  }
  0x5d   :  { %1703 = vmatpush3.bf16.msra.mxu1 %v1877_v1  ;;  %1695 = vmatpush3.bf16.msra.mxu0 %v1879_v3  ;;  %v111_v7 = vpack.c.bf16 %v110_v5, %v109_v4  ;;  %v1604_v8 = vld [vmem:[%s2469_s6] ss:$0 sm:$0xff]  ;;  %s2066_s6 = smov 120   ;;  %v1882_v26 = vld [vmem:[#allocation9 + $0x8] sm:$0xff]   ;;  %v312_v63 = vld [vmem:[#allocation11 + $0x4] sm:$0xf] }
  0x5e   :  { %1704 = vmatprep.subr.bf16.mxu1 %v2064_v0  ;;  %1696 = vmatprep.subr.bf16.mxu0 %v2064_v0  ;;  %v1600_v10 = vld [vmem:[%s2468_s5] ss:$0 sm:$0xff]  ;;  %v2270_v1 = vsel %vm377_vm3, %v312_v63, 0 }
  0x5f   :  { %v1881_v25 = vld [vmem:[#allocation9] sm:$0xff]  }
  0x60   :  { %v1608_v43 = vld [vmem:[%s2470_s7] ss:$0 sm:$0xff]  ;;  %s2068_s7 = smov 104  }
  0x61   :  { %1705 = vmatpush3.bf16.msra.mxu1 %v1878_v2  ;;  %1697 = vmatpush3.bf16.msra.mxu0 %v1880_v6  ;;  %v311_v6 = vld [vmem:[#allocation11] sm:$0xf] }
  0x62   :  { %1718 = vmatprep.subr.bf16.mxu1 %v2064_v0  ;;  %1710 = vmatprep.subr.bf16.mxu0 %v2064_v0 }
  0x64   :  { %1707 = vmatmul.mubr.msk.bf16.vlgmr.msra.gmra.mrb[0].mxu1 %vm106_vm0, %v111_v7  ;;  %1699 = vmatmul.mubr.msk.bf16.vlgmr.msra.gmra.mrb[0].mxu0 %vm106_vm0, %v111_v7 }
  0x65   :  { %1720 = vmatprep.mubr.msk.bf16.mxu1 %vm2065_vm1, %v2064_v0  ;;  %1714 = vmatprep.mubr.msk.bf16.mxu0 %vm2065_vm1, %v2064_v0 }
  0x66   :  { %1711 = vmatpush3.bf16.msra.mxu0 %v1881_v25 }
  0x67   :  { %1712 = vmatprep.subr.bf16.mxu0 %v2064_v0 }
  0x6a   :  { %1713 = vmatpush3.bf16.msra.mxu0 %v1882_v26 }
  0x6b   :  { %1724 = vmatprep.subr.bf16.mxu0 %v2064_v0 }
  0x6d   :  { %1715 = vmatmul.mubr.msk.bf16.vlgmr.msra.gmra.mrb[4].mxu0 %vm106_vm0, %v111_v7 }
  0x6e   :  { %1726 = vmatprep.mubr.msk.bf16.mxu0 %vm2065_vm1, %v2064_v0 }
 0x137   :  { %v237_v9 = vpop.f32.mrb[0].mxu1  ;;  %v173_v13 = vpop.f32.mrb[0].mxu0 }
 0x138   :  { %v1708_v11 = vpop.f32.mrb[1].mxu1  ;;  %v238_v14 = vadd.f32 %v1604_v8, %v237_v9  ;;  %v174_v17 = vadd.f32 %v1600_v10, %v173_v13  ;;  %v1700_v18 = vpop.f32.mrb[1].mxu0  ;;  %v2277_v9 = vsel %vm377_vm3, %v311_v6, 0 }
 0x139   :  { %v240_v12 = vpop.f32.mrb[2].mxu1  ;;  %v176_v19 = vpop.f32.mrb[2].mxu0 }
 0x13a   :  { %v241_v15 = vadd.f32 %v1604_v8, %v240_v12  ;;  %v1709_v16 = vpop.f32.mrb[3].mxu1  ;;  %v177_v21 = vadd.f32 %v1600_v10, %v176_v19  ;;  %v1701_v22 = vpop.f32.mrb[3].mxu0 }
 0x13c   :  { %v2221_v20 = vpack.c.bf16 %v241_v15, %v238_v14  ;;  %v2225_v23 = vpack.c.bf16 %v177_v21, %v174_v17 }
 0x13e   :  { %426 = vrot.lane.b32.xlu0 %v2221_v20, %s2066_s6  ;;  %v320_v24 = vsel %vm315_vm2, %v2221_v20, 0 }
 0x13f   :  { %1719 = vmatpush3.bf16.xpose.msra.mxu1 %v320_v24 }
 0x140   :  { %1730 = vmatprep.subr.bf16.mxu1 %v2064_v0  ;;  %v301_v44 = vpop.f32.mrb[4].mxu0 }
 0x141   :  { %v302_v45 = vadd.f32 %v1608_v43, %v301_v44  ;;  %v1716_v46 = vpop.f32.mrb[5].mxu0 }
 0x142   :  { %423 = vrot.lane.b32.xlu0 %v2225_v23, %s2066_s6  ;;  %v304_v47 = vpop.f32.mrb[6].mxu0 }
 0x143   :  { %v305_v48 = vadd.f32 %v1608_v43, %v304_v47  ;;  %v1717_v49 = vpop.f32.mrb[7].mxu0 }
 0x145   :  { %v2251_v50 = vpack.c.bf16 %v305_v48, %v302_v45 }
 0x146   :  { %1721 = vmatmul.mubr.msk.bf16.vlgmr.msra.gmra.mrb[4].mxu1 %vm315_vm2, %v2225_v23 }
 0x147   :  { %1732 = vmatprep.mubr.msk.bf16.mxu1 %vm2065_vm1, %v2064_v0  ;;  %v379_v53 = vsel %vm377_vm3, %v2251_v50, 0 }
 0x148   :  { %1725 = vmatpush3.bf16.msra.mxu0 %v379_v53 }
 0x149   :  { %1736 = vmatprep.subr.bf16.mxu0 %v2064_v0 }
 0x1b0   :  { %v427_v27 = vpop.permute.xlu0 %426 }
 0x1b1   :  { %v432_v28 = vsel %vm315_vm2, %v427_v27, 0 }
 0x1b2   :  { %1731 = vmatpush3.bf16.xpose.msra.mxu1 %v432_v28 }
 0x1b3   :  { %1742 = vmatprep.subr.bf16.mxu1 %v2064_v0 }
 0x1b4   :  { %v424_v29 = vpop.permute.xlu0 %423 }
 0x1b9   :  { %1733 = vmatmul.mubr.msk.bf16.vlgmr.msra.gmra.mrb[8].mxu1 %vm315_vm2, %v424_v29 }
 0x1ba   :  { %1744 = vmatprep.mubr.msk.bf16.mxu1 %vm2065_vm1, %v2064_v0  ;;  %1743 = vmatpush3.bf16.msra.mxu1 %v2270_v1 }
 0x1bb   :  { %1754 = vmatprep.subr.bf16.mxu1 %v2064_v0 }
 0x219   :  { %v356_v30 = vpop.f32.mrb[4].mxu1 }
 0x21a   :  { %v1722_v31 = vpop.f32.mrb[5].mxu1  ;;  %v362_v32 = vsel %vm315_vm2, %v356_v30, -inf }
 0x21b   :  { %363 = vmax.xlane.f32.xlu1 %v362_v32  ;;  %v359_v33 = vpop.f32.mrb[6].mxu1 }
 0x21c   :  { %v1723_v34 = vpop.f32.mrb[7].mxu1 }
 0x28c   :  { %v468_v35 = vpop.f32.mrb[8].mxu1 }
 0x28d   :  { %v1734_v36 = vpop.f32.mrb[9].mxu1  ;;  %v474_v37 = vsel %vm315_vm2, %v468_v35, -inf }
 0x28e   :  { %475 = vmax.xlane.f32.xlu1 %v474_v37  ;;  %v471_v38 = vpop.f32.mrb[10].mxu1 }
 0x28f   :  { %v1735_v39 = vpop.f32.mrb[11].mxu1 }
 0x2a8   :  { %v364_v40 = vpop.xlane.xlu1 %363 }
 0x2a9   :  { %v365_v41 = vsub.f32 %v356_v30, %v364_v40 }
 0x2ab   :  { %v366_v42 = vmul.f32 1.442695, %v365_v41 }
 0x2ad   :  { %1883 = vpow2.f32 %v366_v42 }
 0x2b7   :  { %v1884_v51 = vpop.eup %1883 }
 0x2b8   :  { %v368_v52 = vsel %vm315_vm2, %v1884_v51, 0.0 }
 0x2b9   :  { %369 = vadd.xlane.f32.xlu0 %v368_v52 }
 0x2cf   :  { %690 = vrot.lane.b32.xlu0 %v2251_v50, %s2067_s1 }
 0x31b   :  { %v476_v54 = vpop.xlane.xlu1 %475 }
 0x31c   :  { %v477_v55 = vsub.f32 %v468_v35, %v476_v54  ;;  %v313_v54 = vld [vmem:[#allocation11 + $0x8] sm:$0xf] }
 0x31e   :  { %v478_v56 = vmul.f32 1.442695, %v477_v55  ;;  %v2314_v55 = vsel %vm377_vm3, %v313_v54, 0 }
 0x320   :  { %1885 = vpow2.f32 %v478_v56 }
 0x32a   :  { %v1886_v57 = vpop.eup %1885 }
 0x32b   :  { %v480_v58 = vsel %vm315_vm2, %v1886_v57, 0.0 }
 0x32c   :  { %481 = vadd.xlane.f32.xlu1 %v480_v58 }
 0x33d   :  { %487 = vrot.lane.b32.xlu1 %v2251_v50, %s2066_s6 }
 0x341   :  { %630 = vrot.lane.b32.xlu1 %v2221_v20, %s2067_s1 }
 0x345   :  { %628 = vrot.lane.b32.xlu1 %v2225_v23, %s2067_s1 }
 0x346   :  { %v370_v59 = vpop.xlane.xlu0 %369 }
 0x347   :  { %1887 = vrcp.f32 %v370_v59 }
 0x34a   :  { %v691_v10 = vpop.permute.xlu0 %690 }
 0x34b   :  { %v696_v15 = vsel %vm377_vm3, %v691_v10, 0  ;;  %v2326_v10 = vrot.slane %v2221_v20, 4 }
 0x351   :  { %v1888_v60 = vpop.eup %1887 }
 0x352   :  { %v372_v61 = vmul.f32 %v1888_v60, %v1884_v51 }
 0x354   :  { %v373_v62 = vpack.c.bf16 %v372_v61, %v372_v61 }
 0x356   :  { %1727 = vmatmul.mubr.msk.bf16.vlgmr.msra.gmra.mrb[8].mxu0 %vm315_vm2, %v373_v62 }
 0x357   :  { %1738 = vmatprep.mubr.msk.bf16.mxu0 %vm2065_vm1, %v2064_v0 }
 0x3b9   :  { %v482_v2 = vpop.xlane.xlu1 %481 }
 0x3ba   :  { %1889 = vrcp.f32 %v482_v2 }
 0x3bd   :  { %v488_v3 = vpop.permute.xlu1 %487 }
 0x3be   :  { %v493_v4 = vsel %vm377_vm3, %v488_v3, 0 }
 0x3bf   :  { %1737 = vmatpush3.bf16.msra.mxu0 %v493_v4 }
 0x3c0   :  { %1748 = vmatprep.subr.bf16.mxu0 %v2064_v0 }
 0x3c1   :  { %v631_v17 = vpop.permute.xlu1 %630 }
 0x3c2   :  { %v636_v24 = vsel %vm315_vm2, %v631_v17, 0 }
 0x3c4   :  { %v1890_v5 = vpop.eup %1889 }
 0x3c5   :  { %v484_v7 = vmul.f32 %v1890_v5, %v1886_v57  ;;  %v629_v26 = vpop.permute.xlu1 %628 }
 0x3c7   :  { %v485_v8 = vpack.c.bf16 %v484_v7, %v484_v7 }
 0x3c9   :  { %1739 = vmatmul.mubr.msk.bf16.vlgmr.msra.gmra.mrb[12].mxu0 %vm315_vm2, %v485_v8 }
 0x3ca   :  { %1749 = vmatpush3.bf16.msra.mxu0 %v2277_v9  ;;  %1750 = vmatprep.mubr.msk.bf16.mxu0 %vm2065_vm1, %v2064_v0 }
 0x3cb   :  { %1760 = vmatprep.subr.bf16.mxu0 %v2064_v0 }
 0x429   :  { %v415_v11 = vpop.f32.mrb[8].mxu0 }
 0x42a   :  { %v421_v12 = vpack.c.bf16 %v415_v11, %v415_v11  ;;  %v1728_v13 = vpop.f32.mrb[9].mxu0  ;;  %v2331_v11 = vrot.slane %v2225_v23, 4 }
 0x42b   :  { %v418_v14 = vpop.f32.mrb[10].mxu0 }
 0x42c   :  { %v1729_v16 = vpop.f32.mrb[11].mxu0  ;;  %1751 = vmatmul.mubr.msk.bf16.vlgmr.msra.gmra.mrb[16].mxu0 %vm315_vm2, %v421_v12  ;;  %v314_v12 = vld [vmem:[#allocation11 + $0xc] sm:$0xf] }
 0x42d   :  { %1761 = vmatpush3.bf16.msra.mxu0 %v696_v15  ;;  %1762 = vmatprep.mubr.msk.bf16.mxu0 %vm2065_vm1, %v2064_v0  ;;  %v2336_v14 = vsel %vm377_vm3, %v314_v12, 0 }
 0x42e   :  { %1772 = vmatprep.subr.bf16.mxu0 %v2064_v0 }
 0x49c   :  { %v529_v18 = vpop.f32.mrb[12].mxu0 }
 0x49d   :  { %v535_v19 = vpack.c.bf16 %v529_v18, %v529_v18  ;;  %v1740_v21 = vpop.f32.mrb[13].mxu0 }
 0x49e   :  { %v532_v22 = vpop.f32.mrb[14].mxu0 }
 0x49f   :  { %v1741_v25 = vpop.f32.mrb[15].mxu0  ;;  %1745 = vmatmul.mubr.msk.bf16.vlgmr.msra.gmra.mrb[12].mxu1 %vm315_vm2, %v535_v19 }
 0x4a0   :  { %1755 = vmatpush3.bf16.xpose.msra.mxu1 %v636_v24  ;;  %1756 = vmatprep.mubr.msk.bf16.mxu1 %vm2065_vm1, %v2064_v0  ;;  %v953_v25 = vsel %vm315_vm2, %v2326_v10, 0 }
 0x4a1   :  { %1766 = vmatprep.subr.bf16.mxu1 %v2064_v0 }
 0x4a7   :  { %1757 = vmatmul.mubr.msk.bf16.vlgmr.msra.gmra.mrb[16].mxu1 %vm315_vm2, %v629_v26 }
 0x4a8   :  { %1768 = vmatprep.mubr.msk.bf16.mxu1 %vm2065_vm1, %v2064_v0  ;;  %1767 = vmatpush3.bf16.msra.mxu1 %v2314_v55 }
 0x4a9   :  { %1778 = vmatprep.subr.bf16.mxu1 %v2064_v0 }
 0x4ff   :  { %v622_v27 = vpop.f32.mrb[16].mxu0 }
 0x500   :  { %v1752_v28 = vpop.f32.mrb[17].mxu0 }
 0x501   :  { %v625_v29 = vpop.f32.mrb[18].mxu0 }
 0x502   :  { %v1753_v30 = vpop.f32.mrb[19].mxu0  ;;  %v2363_v29 = vrot.slane %v2251_v50, 4 }
 0x572   :  { %v576_v31 = vpop.f32.mrb[12].mxu1 }
 0x573   :  { %v2297_v32 = vadd.f32 %v622_v27, %v576_v31  ;;  %v1746_v33 = vpop.f32.mrb[13].mxu1 }
 0x574   :  { %v579_v34 = vpop.f32.mrb[14].mxu1 }
 0x575   :  { %v1747_v35 = vpop.f32.mrb[15].mxu1 }
 0x576   :  { %v1012_v35 = vsel %vm377_vm3, %v2363_v29, 0 }
 0x57a   :  { %v672_v36 = vpop.f32.mrb[16].mxu1 }
 0x57b   :  { %v1758_v37 = vpop.f32.mrb[17].mxu1  ;;  %v678_v38 = vsel %vm315_vm2, %v672_v36, -inf }
 0x57c   :  { %679 = vmax.xlane.f32.xlu1 %v678_v38  ;;  %v675_v39 = vpop.f32.mrb[18].mxu1 }
 0x57d   :  { %v1759_v40 = vpop.f32.mrb[19].mxu1 }
 0x609   :  { %v680_v41 = vpop.xlane.xlu1 %679 }
 0x60a   :  { %v681_v42 = vsub.f32 %v672_v36, %v680_v41 }
 0x60c   :  { %v682_v43 = vmul.f32 1.442695, %v681_v42 }
 0x60e   :  { %1891 = vpow2.f32 %v682_v43 }
 0x618   :  { %v1892_v44 = vpop.eup %1891 }
 0x619   :  { %v684_v45 = vsel %vm315_vm2, %v1892_v44, 0.0 }
 0x61a   :  { %685 = vadd.xlane.f32.xlu0 %v684_v45 }
 0x630   :  { %788 = vrot.lane.b32.xlu0 %v2221_v20, %s2068_s7 }
 0x634   :  { %786 = vrot.lane.b32.xlu0 %v2225_v23, %s2068_s7 }
 0x6a7   :  { %v686_v46 = vpop.xlane.xlu0 %685 }
 0x6a8   :  { %1893 = vrcp.f32 %v686_v46 }
 0x6ab   :  { %v789_v49 = vpop.permute.xlu0 %788 }
 0x6ac   :  { %v794_v52 = vsel %vm315_vm2, %v789_v49, 0 }
 0x6af   :  { %v787_v53 = vpop.permute.xlu0 %786 }
 0x6b2   :  { %v1894_v47 = vpop.eup %1893 }
 0x6b3   :  { %v688_v48 = vmul.f32 %v1894_v47, %v1892_v44 }
 0x6b5   :  { %v689_v51 = vpack.c.bf16 %v688_v48, %v688_v48 }
 0x6b7   :  { %1763 = vmatmul.mubr.msk.bf16.vlgmr.msra.gmra.mrb[20].mxu0 %vm315_vm2, %v689_v51 }
 0x6b8   :  { %1773 = vmatpush3.bf16.xpose.msra.mxu0 %v794_v52  ;;  %1774 = vmatprep.mubr.msk.bf16.mxu0 %vm2065_vm1, %v2064_v0 }
 0x6b9   :  { %1784 = vmatprep.subr.bf16.mxu0 %v2064_v0 }
 0x6bf   :  { %1775 = vmatmul.mubr.msk.bf16.vlgmr.msra.gmra.mrb[24].mxu0 %vm315_vm2, %v787_v53 }
 0x6c0   :  { %1786 = vmatprep.mubr.msk.bf16.mxu0 %vm2065_vm1, %v2064_v0  ;;  %1785 = vmatpush3.bf16.msra.mxu0 %v2336_v14 }
 0x6c1   :  { %1796 = vmatprep.subr.bf16.mxu0 %v2064_v0 }
 0x78a   :  { %v732_v56 = vpop.f32.mrb[20].mxu0 }
 0x78b   :  { %v738_v57 = vpack.c.bf16 %v732_v56, %v732_v56  ;;  %v1764_v58 = vpop.f32.mrb[21].mxu0 }
 0x78c   :  { %v735_v59 = vpop.f32.mrb[22].mxu0 }
 0x78d   :  { %v1765_v60 = vpop.f32.mrb[23].mxu0  ;;  %1769 = vmatmul.mubr.msk.bf16.vlgmr.msra.gmra.mrb[20].mxu1 %vm315_vm2, %v738_v57  ;;  %v944_v57 = vld [vmem:[#allocation2] sm:$0xff] }
 0x78e   :  { %1780 = vmatprep.mubr.msk.bf16.mxu1 %vm2065_vm1, %v2064_v0 }
 0x792   :  { %v830_v61 = vpop.f32.mrb[24].mxu0 }
 0x793   :  { %v1776_v62 = vpop.f32.mrb[25].mxu0  ;;  %v836_v63 = vsel %vm315_vm2, %v830_v61, -inf }
 0x794   :  { %837 = vmax.xlane.f32.xlu0 %v836_v63  ;;  %v833_v2 = vpop.f32.mrb[26].mxu0  ;;  %v2386_v63 = vld [vmem:[%s2471_s8] ss:$0 sm:$0xff]  ;;  %s2069_s8 = smov [#allocation12]  }
 0x795   :  { %v1777_v3 = vpop.f32.mrb[27].mxu0  ;;  %s1586_s15 = sshll.u32 %s2069_s8, 4  ;;  %s1587_s15 = int_to_ptr.vmem [resolvable:$true] %s1586_s15 }
 0x796   :  { %s2025_s16 = scalar_lea.vmem %s1587_s15, 256  ;;  %p2030_p13 = scmp.lt.s32.totalorder %s1587_s15, %s1587_s15 }
 0x797   :  { %p2026_p12 = scmp.ne.s32.totalorder %s1587_s15, %s2025_s16  ;;  %p2031_p0 = scmp.lt.s32.totalorder %s2025_s16, %s2025_s16 }
 0x799   :  { %p2032_p1 = por %p2031_p0, %p2030_p13 }
 0x79b   :  { %p2033_p2 = pnand %p2032_p1, %p2026_p12 }
 0x821   :  { %v838_v4 = vpop.xlane.xlu0 %837 }
 0x822   :  { %v839_v5 = vsub.f32 %v830_v61, %v838_v4 }
 0x824   :  { %v840_v6 = vmul.f32 1.442695, %v839_v5 }
 0x826   :  { %1895 = vpow2.f32 %v840_v6 }
 0x830   :  { %v1896_v7 = vpop.eup %1895 }
 0x831   :  { %v842_v8 = vsel %vm315_vm2, %v1896_v7, 0.0 }
 0x832   :  { %843 = vadd.xlane.f32.xlu1 %v842_v8 }
 0x843   :  { %848 = vrot.lane.b32.xlu1 %v2251_v50, %s2068_s7 }
 0x847   :  { %1057 = vrot.lane.b32.xlu1 %v2326_v10, %s2066_s6 }
 0x84b   :  { %1055 = vrot.lane.b32.xlu1 %v2331_v11, %s2066_s6 }
 0x860   :  { %v779_v13 = vpop.f32.mrb[20].mxu1 }
 0x861   :  { %v2339_v15 = vadd.f32 %v779_v13, %v2297_v32  ;;  %v1770_v16 = vpop.f32.mrb[21].mxu1 }
 0x862   :  { %v782_v20 = vpop.f32.mrb[22].mxu1 }
 0x863   :  { %v1771_v17 = vpop.f32.mrb[23].mxu1 }
 0x8bf   :  { %v844_v23 = vpop.xlane.xlu1 %843 }
 0x8c0   :  { %1897 = vrcp.f32 %v844_v23 }
 0x8c3   :  { %v849_v18 = vpop.permute.xlu1 %848 }
 0x8c4   :  { %v854_v19 = vsel %vm377_vm3, %v849_v18, 0 }
 0x8c5   :  { %1779 = vmatpush3.bf16.msra.mxu1 %v854_v19 }
 0x8c6   :  { %1790 = vmatprep.subr.bf16.mxu1 %v2064_v0 }
 0x8c7   :  { %v1058_v26 = vpop.permute.xlu1 %1057 }
 0x8c8   :  { %v1063_v27 = vsel %vm315_vm2, %v1058_v26, 0 }
 0x8ca   :  { %v1898_v21 = vpop.eup %1897 }
 0x8cb   :  { %v846_v22 = vmul.f32 %v1898_v21, %v1896_v7  ;;  %v1056_v28 = vpop.permute.xlu1 %1055 }
 0x8cd   :  { %v847_v24 = vpack.c.bf16 %v846_v22, %v846_v22 }
 0x8cf   :  { %1781 = vmatmul.mubr.msk.bf16.vlgmr.msra.gmra.mrb[24].mxu1 %vm315_vm2, %v847_v24 }
 0x8d0   :  { %1791 = vmatpush3.bf16.xpose.msra.mxu1 %v953_v25  ;;  %1792 = vmatprep.mubr.msk.bf16.mxu1 %vm2065_vm1, %v2064_v0 }
 0x8d1   :  { %1802 = vmatprep.subr.bf16.mxu1 %v2064_v0 }
 0x8d7   :  { %1793 = vmatmul.mubr.msk.bf16.vlgmr.msra.gmra.mrb[28].mxu1 %vm315_vm2, %v2331_v11 }
 0x8d8   :  { %1803 = vmatpush3.bf16.xpose.msra.mxu1 %v1063_v27  ;;  %1804 = vmatprep.mubr.msk.bf16.mxu1 %vm2065_vm1, %v2064_v0 }
 0x8d9   :  { %1814 = vmatprep.subr.bf16.mxu1 %v2064_v0 }
 0x8df   :  { %1805 = vmatmul.mubr.msk.bf16.vlgmr.msra.gmra.mrb[32].mxu1 %vm315_vm2, %v1056_v28 }
 0x8e0   :  { %1815 = vmatpush3.bf16.msra.mxu1 %v2270_v1  ;;  %1816 = vmatprep.mubr.msk.bf16.mxu1 %vm2065_vm1, %v2064_v0 }
 0x8e1   :  { %1826 = vmatprep.subr.bf16.mxu1 %v2064_v0 }
 0x9a2   :  { %v890_v30 = vpop.f32.mrb[24].mxu1 }
 0x9a3   :  { %v896_v31 = vpack.c.bf16 %v890_v30, %v890_v30  ;;  %v1782_v32 = vpop.f32.mrb[25].mxu1 }
 0x9a4   :  { %v893_v33 = vpop.f32.mrb[26].mxu1 }
 0x9a5   :  { %v1783_v34 = vpop.f32.mrb[27].mxu1  ;;  %1787 = vmatmul.mubr.msk.bf16.vlgmr.msra.gmra.mrb[28].mxu0 %vm315_vm2, %v896_v31 }
 0x9a6   :  { %1797 = vmatpush3.bf16.msra.mxu0 %v1012_v35  ;;  %1798 = vmatprep.mubr.msk.bf16.mxu0 %vm2065_vm1, %v2064_v0 }
 0x9a7   :  { %1808 = vmatprep.subr.bf16.mxu0 %v2064_v0 }
 0x9aa   :  { %v989_v1 = vpop.f32.mrb[28].mxu1 }
 0x9ab   :  { %v1794_v36 = vpop.f32.mrb[29].mxu1  ;;  %v995_v50 = vsel %vm315_vm2, %v989_v1, -inf }
 0x9ac   :  { %996 = vmax.xlane.f32.xlu1 %v995_v50  ;;  %v992_v37 = vpop.f32.mrb[30].mxu1 }
 0x9ad   :  { %v1795_v38 = vpop.f32.mrb[31].mxu1 }
 0x9b2   :  { %v1099_v39 = vpop.f32.mrb[32].mxu1 }
 0x9b3   :  { %v1806_v40 = vpop.f32.mrb[33].mxu1  ;;  %v1105_v41 = vsel %vm315_vm2, %v1099_v39, -inf }
 0x9b4   :  { %1106 = vmax.xlane.f32.xlu0 %v1105_v41  ;;  %v1102_v42 = vpop.f32.mrb[34].mxu1 }
 0x9b5   :  { %v1807_v43 = vpop.f32.mrb[35].mxu1 }
 0x9bd   :  { %1252 = vrot.lane.b32.xlu1 %v2331_v11, %s2067_s1 }
 0xa39   :  { %v997_v44 = vpop.xlane.xlu1 %996 }
 0xa3a   :  { %v998_v45 = vsub.f32 %v989_v1, %v997_v44 }
 0xa3c   :  { %v999_v46 = vmul.f32 1.442695, %v998_v45 }
 0xa3d   :  { %v1253_v30 = vpop.permute.xlu1 %1252 }
 0xa3e   :  { %1899 = vpow2.f32 %v999_v46 }
 0xa41   :  { %v1107_v47 = vpop.xlane.xlu0 %1106 }
 0xa42   :  { %v1108_v48 = vsub.f32 %v1099_v39, %v1107_v47 }
 0xa44   :  { %v1109_v49 = vmul.f32 1.442695, %v1108_v48 }
 0xa46   :  { %1901 = vpow2.f32 %v1109_v49 }
 0xa48   :  { %v1900_v51 = vpop.eup %1899 }
 0xa49   :  { %v1001_v52 = vsel %vm315_vm2, %v1900_v51, 0.0 }
 0xa4a   :  { %1002 = vadd.xlane.f32.xlu0 %v1001_v52 }
 0xa50   :  { %v1902_v53 = vpop.eup %1901 }
 0xa51   :  { %v1111_v54 = vsel %vm315_vm2, %v1902_v53, 0.0 }
 0xa52   :  { %1112 = vadd.xlane.f32.xlu0 %v1111_v54 }
 0xa68   :  { %1117 = vrot.lane.b32.xlu0 %v2363_v29, %s2066_s6 }
 0xa6c   :  { %1254 = vrot.lane.b32.xlu0 %v2326_v10, %s2067_s1 }
 0xa78   :  { %v937_v56 = vpop.f32.mrb[28].mxu0 }
 0xa79   :  { %v943_v58 = vadd.f32 %v937_v56, %v2339_v15  ;;  %v1788_v59 = vpop.f32.mrb[29].mxu0 }
 0xa7a   :  { %v940_v60 = vpop.f32.mrb[30].mxu0 }
 0xa7b   :  { %v945_v61 = vadd.f32 %v944_v57, %v943_v58  ;;  %v1789_v62 = vpop.f32.mrb[31].mxu0 }
 0xa7d   :  { %946 = vst.msk [vmem:[#allocation2] sm:$0xff] %vm106_vm0, %v945_v61 }
 0xa84   :  { %v1568_v2 = vld [vmem:[#allocation2] sm:$0xff] }
 0xa85   :  { %v1577_v3 = vadd.f32 %v2386_v63, %v1568_v2 }
 0xa87   :  { %1579 = vst.msk [vmem:[#allocation12] sm:$0xff] %vm106_vm0, %v1577_v3 }
 0xad7   :  { %v1003_v4 = vpop.xlane.xlu0 %1002 }
 0xad8   :  { %1903 = vrcp.f32 %v1003_v4 }
 0xadf   :  { %v1113_v5 = vpop.xlane.xlu0 %1112 }
 0xae0   :  { %1905 = vrcp.f32 %v1113_v5 }
 0xae2   :  { %v1904_v6 = vpop.eup %1903 }
 0xae3   :  { %v1005_v7 = vmul.f32 %v1904_v6, %v1900_v51  ;;  %v1118_v8 = vpop.permute.xlu0 %1117 }
 0xae4   :  { %v1123_v13 = vsel %vm377_vm3, %v1118_v8, 0 }
 0xae5   :  { %v1006_v12 = vpack.c.bf16 %v1005_v7, %v1005_v7 }
 0xae7   :  { %1799 = vmatmul.mubr.msk.bf16.vlgmr.msra.gmra.mrb[32].mxu0 %vm315_vm2, %v1006_v12  ;;  %v1255_v22 = vpop.permute.xlu0 %1254 }
 0xae8   :  { %1809 = vmatpush3.bf16.msra.mxu0 %v1123_v13  ;;  %1810 = vmatprep.mubr.msk.bf16.mxu0 %vm2065_vm1, %v2064_v0  ;;  %v1260_v27 = vsel %vm315_vm2, %v1255_v22, 0 }
 0xae9   :  { %1820 = vmatprep.subr.bf16.mxu0 %v2064_v0 }
 0xaea   :  { %v1906_v15 = vpop.eup %1905 }
 0xaeb   :  { %v1115_v16 = vmul.f32 %v1906_v15, %v1902_v53 }
 0xaed   :  { %v1116_v20 = vpack.c.bf16 %v1115_v16, %v1115_v16 }
 0xaef   :  { %1811 = vmatmul.mubr.msk.bf16.vlgmr.msra.gmra.mrb[36].mxu0 %vm315_vm2, %v1116_v20 }
 0xaf0   :  { %1821 = vmatpush3.bf16.msra.mxu0 %v2277_v9  ;;  %1822 = vmatprep.mubr.msk.bf16.mxu0 %vm2065_vm1, %v2064_v0 }
 0xaf1   :  { %1832 = vmatprep.subr.bf16.mxu0 %v2064_v0 }
 0xbba   :  { %v1048_v17 = vpop.f32.mrb[32].mxu0 }
 0xbbb   :  { %v1054_v23 = vpack.c.bf16 %v1048_v17, %v1048_v17  ;;  %v1800_v18 = vpop.f32.mrb[33].mxu0 }
 0xbbc   :  { %v1051_v19 = vpop.f32.mrb[34].mxu0 }
 0xbbd   :  { %v1801_v21 = vpop.f32.mrb[35].mxu0  ;;  %1823 = vmatmul.mubr.msk.bf16.vlgmr.msra.gmra.mrb[40].mxu0 %vm315_vm2, %v1054_v23 }
 0xbbe   :  { %1834 = vmatprep.mubr.msk.bf16.mxu0 %vm2065_vm1, %v2064_v0 }
 0xbc2   :  { %v1159_v24 = vpop.f32.mrb[36].mxu0 }
 0xbc3   :  { %v1165_v25 = vpack.c.bf16 %v1159_v24, %v1159_v24  ;;  %v1812_v26 = vpop.f32.mrb[37].mxu0 }
 0xbc4   :  { %v1162_v9 = vpop.f32.mrb[38].mxu0 }
 0xbc5   :  { %v1813_v28 = vpop.f32.mrb[39].mxu0  ;;  %1817 = vmatmul.mubr.msk.bf16.vlgmr.msra.gmra.mrb[36].mxu1 %vm315_vm2, %v1165_v25 }
 0xbc6   :  { %1827 = vmatpush3.bf16.xpose.msra.mxu1 %v1260_v27  ;;  %1828 = vmatprep.mubr.msk.bf16.mxu1 %vm2065_vm1, %v2064_v0  ;;  %v1562_v27 = vld [vmem:[#allocation2 + $0x8] sm:$0xff] }
 0xbc7   :  { %1838 = vmatprep.subr.bf16.mxu1 %v2064_v0 }
 0xbcd   :  { %1829 = vmatmul.mubr.msk.bf16.vlgmr.msra.gmra.mrb[40].mxu1 %vm315_vm2, %v1253_v30 }
 0xbce   :  { %1839 = vmatpush3.bf16.msra.mxu1 %v2314_v55  ;;  %1840 = vmatprep.mubr.msk.bf16.mxu1 %vm2065_vm1, %v2064_v0 }
 0xbcf   :  { %1850 = vmatprep.subr.bf16.mxu1 %v2064_v0 }
 0xc90   :  { %v1246_v31 = vpop.f32.mrb[40].mxu0 }
 0xc91   :  { %v1824_v32 = vpop.f32.mrb[41].mxu0 }
 0xc92   :  { %v1249_v33 = vpop.f32.mrb[42].mxu0 }
 0xc93   :  { %v1825_v34 = vpop.f32.mrb[43].mxu0 }
 0xc98   :  { %v1203_v35 = vpop.f32.mrb[36].mxu1 }
 0xc99   :  { %v2413_v1 = vadd.f32 %v1246_v31, %v1203_v35  ;;  %v1818_v36 = vpop.f32.mrb[37].mxu1 }
 0xc9a   :  { %v1206_v50 = vpop.f32.mrb[38].mxu1 }
 0xc9b   :  { %v1819_v37 = vpop.f32.mrb[39].mxu1 }
 0xca0   :  { %v1296_v38 = vpop.f32.mrb[40].mxu1 }
 0xca1   :  { %v1830_v39 = vpop.f32.mrb[41].mxu1  ;;  %v1302_v40 = vsel %vm315_vm2, %v1296_v38, -inf }
 0xca2   :  { %1303 = vmax.xlane.f32.xlu0 %v1302_v40  ;;  %v1299_v55 = vpop.f32.mrb[42].mxu1 }
 0xca3   :  { %v1831_v41 = vpop.f32.mrb[43].mxu1 }
 0xcb8   :  { %1314 = vrot.lane.b32.xlu0 %v2363_v29, %s2067_s1 }
 0xcbc   :  { %1407 = vrot.lane.b32.xlu0 %v2331_v11, %s2068_s7 }
 0xd2f   :  { %v1304_v42 = vpop.xlane.xlu0 %1303 }
 0xd30   :  { %v1305_v43 = vsub.f32 %v1296_v38, %v1304_v42 }
 0xd32   :  { %v1306_v44 = vmul.f32 1.442695, %v1305_v43 }
 0xd33   :  { %v1315_v45 = vpop.permute.xlu0 %1314 }
 0xd34   :  { %1907 = vpow2.f32 %v1306_v44  ;;  %v1320_v46 = vsel %vm377_vm3, %v1315_v45, 0 }
 0xd35   :  { %1833 = vmatpush3.bf16.msra.mxu0 %v1320_v46 }
 0xd36   :  { %1844 = vmatprep.subr.bf16.mxu0 %v2064_v0 }
 0xd37   :  { %v1408_v56 = vpop.permute.xlu0 %1407 }
 0xd3e   :  { %v1908_v47 = vpop.eup %1907 }
 0xd3f   :  { %v1308_v48 = vsel %vm315_vm2, %v1908_v47, 0.0 }
 0xd40   :  { %1309 = vadd.xlane.f32.xlu1 %v1308_v48 }
 0xd51   :  { %1409 = vrot.lane.b32.xlu1 %v2326_v10, %s2068_s7 }
 0xdcd   :  { %v1310_v49 = vpop.xlane.xlu1 %1309 }
 0xdce   :  { %1909 = vrcp.f32 %v1310_v49 }
 0xdd1   :  { %v1410_v52 = vpop.permute.xlu1 %1409 }
 0xdd2   :  { %v1415_v54 = vsel %vm315_vm2, %v1410_v52, 0 }
 0xdd8   :  { %v1910_v11 = vpop.eup %1909 }
 0xdd9   :  { %v1312_v51 = vmul.f32 %v1910_v11, %v1908_v47 }
 0xddb   :  { %v1313_v53 = vpack.c.bf16 %v1312_v51, %v1312_v51 }
 0xddd   :  { %1835 = vmatmul.mubr.msk.bf16.vlgmr.msra.gmra.mrb[44].mxu0 %vm315_vm2, %v1313_v53 }
 0xdde   :  { %1845 = vmatpush3.bf16.xpose.msra.mxu0 %v1415_v54  ;;  %1846 = vmatprep.mubr.msk.bf16.mxu0 %vm2065_vm1, %v2064_v0 }
 0xddf   :  { %1856 = vmatprep.subr.bf16.mxu0 %v2064_v0 }
 0xde5   :  { %1847 = vmatmul.mubr.msk.bf16.vlgmr.msra.gmra.mrb[48].mxu0 %vm315_vm2, %v1408_v56 }
 0xde6   :  { %1857 = vmatpush3.bf16.msra.mxu0 %v2336_v14  ;;  %1858 = vmatprep.mubr.msk.bf16.mxu0 %vm2065_vm1, %v2064_v0 }
 0xeb0   :  { %v1356_v10 = vpop.f32.mrb[44].mxu0 }
 0xeb1   :  { %v1362_v57 = vpack.c.bf16 %v1356_v10, %v1356_v10  ;;  %v1836_v58 = vpop.f32.mrb[45].mxu0 }
 0xeb2   :  { %v1359_v59 = vpop.f32.mrb[46].mxu0 }
 0xeb3   :  { %v1837_v60 = vpop.f32.mrb[47].mxu0  ;;  %1841 = vmatmul.mubr.msk.bf16.vlgmr.msra.gmra.mrb[44].mxu1 %vm315_vm2, %v1362_v57 }
 0xeb4   :  { %1852 = vmatprep.mubr.msk.bf16.mxu1 %vm2065_vm1, %v2064_v0 }
 0xeb8   :  { %v1451_v61 = vpop.f32.mrb[48].mxu0 }
 0xeb9   :  { %v1848_v62 = vpop.f32.mrb[49].mxu0  ;;  %v1457_v2 = vsel %vm315_vm2, %v1451_v61, -inf }
 0xeba   :  { %1458 = vmax.xlane.f32.xlu0 %v1457_v2  ;;  %v1454_v3 = vpop.f32.mrb[50].mxu0 }
 0xebb   :  { %v1849_v14 = vpop.f32.mrb[51].mxu0 }
 0xed0   :  { %1469 = vrot.lane.b32.xlu0 %v2363_v29, %s2068_s7 }
 0xf47   :  { %v1459_v4 = vpop.xlane.xlu0 %1458 }
 0xf48   :  { %v1460_v5 = vsub.f32 %v1451_v61, %v1459_v4 }
 0xf4a   :  { %v1461_v6 = vmul.f32 1.442695, %v1460_v5 }
 0xf4b   :  { %v1470_v7 = vpop.permute.xlu0 %1469 }
 0xf4c   :  { %1911 = vpow2.f32 %v1461_v6  ;;  %v1475_v8 = vsel %vm377_vm3, %v1470_v7, 0 }
 0xf4d   :  { %1851 = vmatpush3.bf16.msra.mxu1 %v1475_v8 }
 0xf56   :  { %v1912_v12 = vpop.eup %1911 }
 0xf57   :  { %v1463_v0 = vsel %vm315_vm2, %v1912_v12, 0.0 }
 0xf58   :  { %1464 = vadd.xlane.f32.xlu1 %v1463_v0 }
 0xf86   :  { %v1400_v13 = vpop.f32.mrb[44].mxu1 }
 0xf87   :  { %v1406_v15 = vadd.f32 %v1400_v13, %v2413_v1  ;;  %v1842_v16 = vpop.f32.mrb[45].mxu1 }
 0xf88   :  { %v1403_v20 = vpop.f32.mrb[46].mxu1 }
 0xf89   :  { %v1843_v17 = vpop.f32.mrb[47].mxu1 }
 0xfe5   :  { %v1465_v23 = vpop.xlane.xlu1 %1464 }
 0xfe6   :  { %1913 = vrcp.f32 %v1465_v23 }
 0xff0   :  { %v1914_v29 = vpop.eup %1913 }
 0xff1   :  { %v1467_v18 = vmul.f32 %v1914_v29, %v1912_v12 }
 0xff3   :  { %v1468_v19 = vpack.c.bf16 %v1467_v18, %v1467_v18 }
 0xff5   :  { %1853 = vmatmul.mubr.msk.bf16.vlgmr.msra.gmra.mrb[48].mxu1 %vm315_vm2, %v1468_v19 }
0x10c8   :  { %v1511_v21 = vpop.f32.mrb[48].mxu1 }
0x10c9   :  { %v1517_v22 = vpack.c.bf16 %v1511_v21, %v1511_v21  ;;  %v1854_v24 = vpop.f32.mrb[49].mxu1 }
0x10ca   :  { %v1514_v25 = vpop.f32.mrb[50].mxu1 }
0x10cb   :  { %v1855_v26 = vpop.f32.mrb[51].mxu1  ;;  %1859 = vmatmul.mubr.msk.bf16.vlgmr.msra.gmra.mrb[52].mxu0 %vm315_vm2, %v1517_v22 }
0x119e   :  { %v1555_v9 = vpop.f32.mrb[52].mxu0 }
0x119f   :  { %v1561_v28 = vadd.f32 %v1555_v9, %v1406_v15  ;;  %v1860_v30 = vpop.f32.mrb[53].mxu0 }
0x11a0   :  { %v1558_v31 = vpop.f32.mrb[54].mxu0 }
0x11a1   :  { %v1563_v32 = vadd.f32 %v1562_v27, %v1561_v28  ;;  %v1861_v33 = vpop.f32.mrb[55].mxu0 }
0x11a3   :  { %1564 = vst.msk [vmem:[#allocation2 + $0x8] sm:$0xff] %vm106_vm0, %v1563_v32 }
0x11aa   :  { %v1569_v34 = vld [vmem:[#allocation2 + $0x8] sm:$0xff] }
0x11ab   :  { %v1578_v35 = vadd.f32 %v2386_v63, %v1569_v34 }
0x11ad   :  { %1580 = vst.msk [vmem:[#allocation12 + $0x8] sm:$0xff] %vm106_vm0, %v1578_v35 }
0x11ae   :  { %2036 = shalt.err (!%p2033_p2)
}
0x11af   :  { %s2037_s26 = scalar_lea.hbm %s2472_s9, 256 }
0x11b0   :  { %p2038_p3 = scmp.ne.s32.totalorder %s2472_s9, %s2037_s26  ;;  %p2041_p4 = scmp.lt.u32.totalorder %s2037_s26, %s2472_s9 }
0x11b2   :  { %p2043_p5 = pnand %p2041_p4, %p2038_p3 }
0x11b4   :  { %2046 = shalt.err (!%p2043_p5)
}
0x11b5   :  { %1592 = dma.vmem_to_hbm [thread:$0]  %s1587_s15, 256, %s2472_s9, [#allocation5], %s2060_s3, %s2060_s3, %s2061_s24  }
0x11b6   :  { %2053 = dma.done.wait [#allocation5], 256  }
0x11b7   :  { %2054 = vsyncadd [#allocation5], 4294967040 }
0x11b8   :  { %1596 = vsyncpa [#allocation4], 1 }
0x11b9   :  { %1597 = vsyncpa [#allocation7], 1 }
0x11ba   :  { %1598 = vsyncpa [#allocation10], 1 }
0x11bb   :  { %1599 = vsyncpa [#allocation5], 1 }

</bundles_post_ra>
